<compile_context>
chip_gen: v6e
topology: v6e:2x2x1
jax: 0.10.0
libtpu: 0.0.40
codegen_flags: <defaults>
</compile_context>

<pallas_src>
import functools

import jax
import jax.numpy as jnp
import numpy as np
from jax import lax
from jax.experimental import pallas as pl
from jax.experimental.pallas import tpu as pltpu

_HIGHEST = jax.lax.Precision.HIGHEST


def _density_loss_kernel(mask_ref, valid_ref, px_ref, py_ref, pred_ref,
                         cumh_ref, cumw_ref, out_ref,
                         *, TB, H, W, N, bandwidth):
    f32 = jnp.float32
    eps = f32(1e-8)

    m = mask_ref[...]                     # (TB, 1, 1) validity mask (module arg)
    valid = valid_ref[...]                # (TB, 1, 1) 0 for padded batch rows
    pred = pred_ref[...].astype(f32)      # (TB, H, W) predicted density
    px = px_ref[...]                      # (TB, N, 1) point x coords
    py = py_ref[...]                      # (TB, 1, N) point y coords

    # ---- KDE target density: separable gaussians, combined on the MXU ----
    inv_2bw2 = f32(1.0 / (2.0 * bandwidth * bandwidth))
    xs = lax.broadcasted_iota(jnp.int32, (1, 1, W), 2).astype(f32) * f32(1.0 / (W - 1))
    ys = lax.broadcasted_iota(jnp.int32, (1, H, 1), 1).astype(f32) * f32(1.0 / (H - 1))
    ex = jnp.exp(-((xs - px) ** 2) * inv_2bw2)            # (TB, N, W)
    ey = jnp.exp(-((ys - py) ** 2) * inv_2bw2)            # (TB, H, N)
    target = jnp.einsum('bhn,bnw->bhw', ey, ex,
                        preferred_element_type=f32, precision=_HIGHEST)

    def _sum_hw(x):
        return jnp.sum(jnp.sum(x, axis=2, keepdims=True), axis=1, keepdims=True)

    # ---- mask + normalize to per-sample probability maps ----
    pred_p = pred * m + eps
    tgt_p = target * m + eps
    pred_n = pred_p * (f32(1.0) / _sum_hw(pred_p))        # one reciprocal / sample
    tgt_n = tgt_p * (f32(1.0) / _sum_hw(tgt_p))

    # ---- KLDivLoss(reduction='batchmean'), input = log(pred_n + eps) ----
    kl_b = _sum_hw(tgt_n * jnp.log(tgt_n / (pred_n + eps)))   # (TB, 1, 1)

    # ---- approximate EMD: cumsum of the difference via MXU matmuls ----
    diff = pred_n - tgt_n                                  # (TB, H, W)
    # W-direction cumsum: one flattened big-M 2-D matmul (fills MXU rows).
    cw = jnp.dot(diff.reshape(TB * H, W), cumw_ref[...],
                 preferred_element_type=f32, precision=_HIGHEST)   # (TB*H, W)
    emd_w = _sum_hw(jnp.abs(cw).reshape(TB, H, W))         # (TB, 1, 1)
    # H-direction cumsum: batched matmul against the pre-broadcast constant
    # triangular input (fetched once per core) — avoids an in-kernel
    # broadcast_to and a 3-D minor-dims transpose.
    ch = jnp.einsum('bkh,bhw->bkw', cumh_ref[...], diff,
                    preferred_element_type=f32, precision=_HIGHEST)  # (TB, H, W)
    emd_h = _sum_hw(jnp.abs(ch))                           # (TB, 1, 1)
    emd_b = f32(0.5) * (emd_h + emd_w)

    # ---- peaks: first row-major argmax, decoded with pow2 shift / and ----
    S = 1 if W <= 1 else (1 << (W - 1).bit_length())       # next pow2 >= W
    sh = S.bit_length() - 1
    row_i = lax.broadcasted_iota(jnp.int32, (TB, H, W), 1)
    col_i = lax.broadcasted_iota(jnp.int32, (TB, H, W), 2)
    flat_i = row_i * jnp.int32(S) + col_i                  # row-major order key

    def _min_hw(x):
        return jnp.min(jnp.min(x, axis=2, keepdims=True), axis=1, keepdims=True)

    def _max_hw(x):
        return jnp.max(jnp.max(x, axis=2, keepdims=True), axis=1, keepdims=True)

    def peak_xy(d):
        mx = _max_hw(d)
        idx = _min_hw(jnp.where(d == mx, flat_i, jnp.int32(H * S)))  # (TB,1,1)
        r = idx >> sh                                       # bit-exact decode
        c = idx & jnp.int32(S - 1)
        return (c.astype(f32) * f32(1.0 / (W - 1)),
                r.astype(f32) * f32(1.0 / (H - 1)))

    ppx, ppy = peak_xy(pred_n)
    tpx, tpy = peak_xy(tgt_n)
    dist = jnp.sqrt((ppx - tpx) ** 2 + (ppy - tpy) ** 2)   # (TB, 1, 1)
    # NOTE: fully-masked samples tie at index 0 for both maps and count as a
    # hit — matches the reference semantics.
    hit = (dist < f32(0.1)).astype(f32)

    kl_blk = jnp.sum(kl_b * valid)
    emd_blk = jnp.sum(emd_b * valid)
    hit_blk = jnp.sum(hit * valid)

    # ---- lane-dense per-block partial sums: lanes 0/1/2 = kl / emd / hit ----
    lane = lax.broadcasted_iota(jnp.int32, (1, 1, 128), 2)
    out_ref[...] = (jnp.where(lane == 0, kl_blk, f32(0.0))
                    + jnp.where(lane == 1, emd_blk, f32(0.0))
                    + jnp.where(lane == 2, hit_blk, f32(0.0)))


def density_loss(pred_density, bezier_points, mask=None, *,
                 kde_bandwidth=0.1, block_batch=None):
    """Pallas equivalent of DensityLoss(loss_type='kl_div').forward."""
    B, H, W = pred_density.shape
    assert H > 1 and W > 1, "density maps must satisfy H > 1 and W > 1"
    N = bezier_points.shape[1]
    pred = pred_density                          # keep native dtype; kernel casts
    pts = bezier_points.astype(jnp.float32)
    if mask is None:
        mask_f = jnp.ones((B,), jnp.float32)
    else:
        mask_f = mask.astype(jnp.float32)

    # Batch-block size: amortize the ~0.35us per-grid-step overhead on small
    # maps; cap by a VMEM working-set budget (~16 live (TB,H,W) f32 temps,
    # the (TB,H,H) triangular input and 2x double-buffered pred block).
    if block_batch is None:
        itemsize = jnp.dtype(pred.dtype).itemsize
        per_sample = (16 * H * W + 2 * H * H) * 4 + 2 * H * W * itemsize
        block_batch = max(1, min(256, (20 * 1024 * 1024) // per_sample))
    TB = int(min(B, block_batch))
    NB = -(-B // TB)                             # number of batch blocks (grid)
    B_pad = NB * TB

    valid = jnp.ones((B,), jnp.float32)
    if B_pad != B:                               # pad batch; padded rows valid=0
        p = B_pad - B
        pred = jnp.pad(pred, ((0, p), (0, 0), (0, 0)))
        pts = jnp.pad(pts, ((0, p), (0, 0), (0, 0)))
        mask_f = jnp.pad(mask_f, ((0, p),))
        valid = jnp.pad(valid, ((0, p),))

    px = pts[:, :, 0].reshape(B_pad, N, 1)       # x coords as (B, N, 1)
    py = pts[:, :, 1].reshape(B_pad, 1, N)       # y coords as (B, 1, N)
    mask3 = mask_f.reshape(B_pad, 1, 1)
    valid3 = valid.reshape(B_pad, 1, 1)

    # Triangular cumsum matrices (constant index map -> fetched once per core).
    # LH[k, h] = 1 if h <= k  (lower-tri, pre-broadcast over the batch block)
    # MW[w, k] = 1 if w <= k  (upper-tri, applied from the right)
    cum_h_b = jnp.asarray(
        np.broadcast_to(np.tril(np.ones((H, H), np.float32)), (TB, H, H)))
    cum_w = jnp.asarray(np.triu(np.ones((W, W), np.float32)))

    kernel = functools.partial(_density_loss_kernel, TB=TB, H=H, W=W, N=N,
                               bandwidth=kde_bandwidth)

    def blk3(shape):
        return pl.BlockSpec(shape, lambda g: (g, 0, 0))

    grid_spec = pltpu.PrefetchScalarGridSpec(
        num_scalar_prefetch=0,
        grid=(NB,),
        in_specs=[blk3((TB, 1, 1)),              # mask
                  blk3((TB, 1, 1)),              # valid (batch-padding weight)
                  blk3((TB, N, 1)),              # point x coords
                  blk3((TB, 1, N)),              # point y coords
                  blk3((TB, H, W)),              # predicted density block
                  pl.BlockSpec((TB, H, H), lambda g: (0, 0, 0)),  # H cumsum mat
                  pl.BlockSpec((W, W), lambda g: (0, 0))],        # W cumsum mat
        out_specs=pl.BlockSpec((1, 1, 128), lambda g: (g, 0, 0)),
    )

    partials = pl.pallas_call(
        kernel,
        out_shape=jax.ShapeDtypeStruct((NB, 1, 128), jnp.float32),
        grid_spec=grid_spec,
        compiler_params=pltpu.CompilerParams(
            dimension_semantics=("parallel",),   # megacore-shardable on v7x
            vmem_limit_bytes=48 * 1024 * 1024),
    )(mask3, valid3, px, py, pred, cum_h_b, cum_w)

    sums = jnp.sum(partials[:, 0, :3], axis=0)   # final reduce in the wrapper
    return {"loss": sums[0] / B,                 # KLDiv 'batchmean'
            "emd_loss": sums[1] / (B * H * W),   # .mean() over all elements
            "peak_accuracy": sums[2] / B}


# --- pure-JAX reference (mirrors the PyTorch module) for correctness check ---
def _density_loss_ref(pred, pts, mask=None, bw=0.1):
    B, H, W = pred.shape
    y = jnp.linspace(0.0, 1.0, H)
    x = jnp.linspace(0.0, 1.0, W)
    gy, gx = jnp.meshgrid(y, x, indexing="ij")
    dx = gx[None, None] - pts[:, :, 0][:, :, None, None]
    dy = gy[None, None] - pts[:, :, 1][:, :, None, None]
    tgt = jnp.exp(-(dx ** 2 + dy ** 2) / (2 * bw ** 2)).sum(axis=1)
    if mask is not None:
        pred = pred * mask[:, None, None]
        tgt = tgt * mask[:, None, None]

    def norm(d):
        f = d.reshape(B, -1) + 1e-8
        return (f / f.sum(axis=1, keepdims=True)).reshape(B, H, W)

    pn, tn = norm(pred), norm(tgt)
    kl = jnp.sum(tn * (jnp.log(tn) - jnp.log(pn + 1e-8))) / B
    emd_h = jnp.abs(jnp.cumsum(pn, 1) - jnp.cumsum(tn, 1)).mean()
    emd_w = jnp.abs(jnp.cumsum(pn, 2) - jnp.cumsum(tn, 2)).mean()
    emd = (emd_h + emd_w) / 2

    def peaks(d):
        idx = jnp.argmax(d.reshape(B, -1), axis=1)
        return jnp.stack([(idx % W) / (W - 1), (idx // W) / (H - 1)], axis=1)

    pdist = jnp.linalg.norm(peaks(pn) - peaks(tn), axis=1)
    acc = (pdist < 0.1).astype(jnp.float32).mean()
    return {"loss": kl, "emd_loss": emd, "peak_accuracy": acc}


if __name__ == "__main__":
    key = jax.random.PRNGKey(0)
    k1, k2 = jax.random.split(key)
    B, H, W, N = 2, 16, 16, 8
    pred = jax.random.uniform(k1, (B, H, W), jnp.float32, minval=0.05, maxval=1.0)
    pts = jax.random.uniform(k2, (B, N, 2), jnp.float32, minval=0.0, maxval=1.0)

    # mask=None path
    out = density_loss(pred, pts)
    out = jax.tree_util.tree_map(jax.block_until_ready, out)
    ref = _density_loss_ref(pred, pts, None)
    np.testing.assert_allclose(float(out["loss"]), float(ref["loss"]),
                               rtol=2e-3, atol=1e-5)
    np.testing.assert_allclose(float(out["emd_loss"]), float(ref["emd_loss"]),
                               rtol=2e-3, atol=1e-5)
    np.testing.assert_allclose(float(out["peak_accuracy"]),
                               float(ref["peak_accuracy"]), rtol=0, atol=1e-6)

    # explicit-mask path
    mask = jnp.array([1.0, 0.0], jnp.float32)
    out_m = density_loss(pred, pts, mask)
    out_m = jax.tree_util.tree_map(jax.block_until_ready, out_m)
    ref_m = _density_loss_ref(pred, pts, mask)
    np.testing.assert_allclose(float(out_m["loss"]), float(ref_m["loss"]),
                               rtol=2e-3, atol=1e-5)
    np.testing.assert_allclose(float(out_m["emd_loss"]), float(ref_m["emd_loss"]),
                               rtol=2e-3, atol=1e-5)
    np.testing.assert_allclose(float(out_m["peak_accuracy"]),
                               float(ref_m["peak_accuracy"]), rtol=0, atol=1e-6)

    print("KERNEL_OK")
</pallas_src>

<mosaic_0001>
module attributes {stable_mosaic.version = 11 : i64} {
  func.func @_density_loss_kernel(%arg0: i32, %arg1: memref<2x1x1xf32, #tpu.memory_space<vmem>>, %arg2: memref<2x1x1xf32, #tpu.memory_space<vmem>>, %arg3: memref<2x8x1xf32, #tpu.memory_space<vmem>>, %arg4: memref<2x1x8xf32, #tpu.memory_space<vmem>>, %arg5: memref<2x16x16xf32, #tpu.memory_space<vmem>>, %arg6: memref<2x16x16xf32, #tpu.memory_space<vmem>>, %arg7: memref<16x16xf32, #tpu.memory_space<vmem>>, %arg8: memref<1x1x128xf32, #tpu.memory_space<vmem>>) attributes {dimension_semantics = [#tpu.dimension_semantics<parallel>], iteration_bounds = array<i64: 1>, scalar_prefetch = 0 : i64, scratch_operands = 0 : i64, tpu.core_type = #tpu.core_type<tc>, window_params = [{transform_indices = @transform_0, window_bounds = array<i64: 2, 1, 1>}, {transform_indices = @transform_1, window_bounds = array<i64: 2, 1, 1>}, {transform_indices = @transform_2, window_bounds = array<i64: 2, 8, 1>}, {transform_indices = @transform_3, window_bounds = array<i64: 2, 1, 8>}, {transform_indices = @transform_4, window_bounds = array<i64: 2, 16, 16>}, {pipeline_mode = #tpu.pipeline_mode<synchronous>, transform_indices = @transform_5, window_bounds = array<i64: 2, 16, 16>}, {pipeline_mode = #tpu.pipeline_mode<synchronous>, transform_indices = @transform_6, window_bounds = array<i64: 16, 16>}, {transform_indices = @transform_7, window_bounds = array<i64: 1, 1, 128>}]} {
    %c0 = arith.constant 0 : index
    %c0_0 = arith.constant 0 : index
    %c0_1 = arith.constant 0 : index
    %0 = vector.load %arg1[%c0, %c0_0, %c0_1] : memref<2x1x1xf32, #tpu.memory_space<vmem>>, vector<2x1x1xf32>
    %c0_2 = arith.constant 0 : index
    %c0_3 = arith.constant 0 : index
    %c0_4 = arith.constant 0 : index
    %1 = vector.load %arg2[%c0_2, %c0_3, %c0_4] : memref<2x1x1xf32, #tpu.memory_space<vmem>>, vector<2x1x1xf32>
    %c0_5 = arith.constant 0 : index
    %c0_6 = arith.constant 0 : index
    %c0_7 = arith.constant 0 : index
    %2 = vector.load %arg5[%c0_5, %c0_6, %c0_7] : memref<2x16x16xf32, #tpu.memory_space<vmem>>, vector<2x16x16xf32>
    %c0_8 = arith.constant 0 : index
    %c0_9 = arith.constant 0 : index
    %c0_10 = arith.constant 0 : index
    %3 = vector.load %arg3[%c0_8, %c0_9, %c0_10] : memref<2x8x1xf32, #tpu.memory_space<vmem>>, vector<2x8x1xf32>
    %c0_11 = arith.constant 0 : index
    %c0_12 = arith.constant 0 : index
    %c0_13 = arith.constant 0 : index
    %4 = vector.load %arg4[%c0_11, %c0_12, %c0_13] : memref<2x1x8xf32, #tpu.memory_space<vmem>>, vector<2x1x8xf32>
    %5 = tpu.iota {dimensions = array<i32: 2>} : vector<1x1x16xi32>
    %6 = arith.sitofp %5 : vector<1x1x16xi32> to vector<1x1x16xf32>
    %cst = arith.constant 0.0666666701 : f32
    %7 = vector.broadcast %cst : f32 to vector<1x1x16xf32>
    %8 = arith.mulf %6, %7 : vector<1x1x16xf32>
    %9 = tpu.iota {dimensions = array<i32: 1>} : vector<1x16x1xi32>
    %10 = arith.sitofp %9 : vector<1x16x1xi32> to vector<1x16x1xf32>
    %cst_14 = arith.constant 0.0666666701 : f32
    %11 = vector.broadcast %cst_14 : f32 to vector<1x16x1xf32>
    %12 = arith.mulf %10, %11 : vector<1x16x1xf32>
    %13 = vector.broadcast %8 : vector<1x1x16xf32> to vector<2x8x16xf32>
    %14 = vector.broadcast %3 : vector<2x8x1xf32> to vector<2x8x16xf32>
    %15 = arith.subf %13, %14 : vector<2x8x16xf32>
    %16 = arith.mulf %15, %15 : vector<2x8x16xf32>
    %cst_15 = arith.constant 0.000000e+00 : f32
    %17 = vector.broadcast %cst_15 : f32 to vector<2x8x16xf32>
    %18 = arith.subf %17, %16 : vector<2x8x16xf32>
    %cst_16 = arith.constant 5.000000e+01 : f32
    %19 = vector.broadcast %cst_16 : f32 to vector<2x8x16xf32>
    %20 = arith.mulf %18, %19 : vector<2x8x16xf32>
    %21 = math.exp %20 : vector<2x8x16xf32>
    %22 = vector.broadcast %12 : vector<1x16x1xf32> to vector<2x16x8xf32>
    %23 = vector.broadcast %4 : vector<2x1x8xf32> to vector<2x16x8xf32>
    %24 = arith.subf %22, %23 : vector<2x16x8xf32>
    %25 = arith.mulf %24, %24 : vector<2x16x8xf32>
    %cst_17 = arith.constant 0.000000e+00 : f32
    %26 = vector.broadcast %cst_17 : f32 to vector<2x16x8xf32>
    %27 = arith.subf %26, %25 : vector<2x16x8xf32>
    %cst_18 = arith.constant 5.000000e+01 : f32
    %28 = vector.broadcast %cst_18 : f32 to vector<2x16x8xf32>
    %29 = arith.mulf %27, %28 : vector<2x16x8xf32>
    %30 = math.exp %29 : vector<2x16x8xf32>
    "tpu.trace_start"() <{level = 10 : i32, message = "bhn,bnw->bhw"}> : () -> ()
    %cst_19 = arith.constant dense<0.000000e+00> : vector<2x16x16xf32>
    %31 = tpu.matmul %30, %21, %cst_19 {dimension_numbers = #tpu.dot_dimension_numbers<[2], [1], [1], [2], [0, 0, 0, 1, 1, 2], [0], [0]>, precision = #tpu.contract_precision<fp32>} : vector<2x16x8xf32>, vector<2x8x16xf32>, vector<2x16x16xf32> -> vector<2x16x16xf32>
    "tpu.trace_stop"() : () -> ()
    %32 = vector.broadcast %0 : vector<2x1x1xf32> to vector<2x16x16xf32>
    %33 = arith.mulf %2, %32 : vector<2x16x16xf32>
    %cst_20 = arith.constant 9.99999993E-9 : f32
    %34 = vector.broadcast %cst_20 : f32 to vector<2x16x16xf32>
    %35 = arith.addf %33, %34 : vector<2x16x16xf32>
    %36 = vector.broadcast %0 : vector<2x1x1xf32> to vector<2x16x16xf32>
    %37 = arith.mulf %31, %36 : vector<2x16x16xf32>
    %cst_21 = arith.constant 9.99999993E-9 : f32
    %38 = vector.broadcast %cst_21 : f32 to vector<2x16x16xf32>
    %39 = arith.addf %37, %38 : vector<2x16x16xf32>
    %cst_22 = arith.constant dense<0.000000e+00> : vector<2x16xf32>
    %40 = vector.multi_reduction <add>, %35, %cst_22 [2] : vector<2x16x16xf32> to vector<2x16xf32>
    %41 = vector.shape_cast %40 : vector<2x16xf32> to vector<2x16x1xf32>
    %cst_23 = arith.constant dense<0.000000e+00> : vector<2x1xf32>
    %42 = vector.multi_reduction <add>, %41, %cst_23 [1] : vector<2x16x1xf32> to vector<2x1xf32>
    %43 = vector.shape_cast %42 : vector<2x1xf32> to vector<2x1x1xf32>
    %cst_24 = arith.constant 1.000000e+00 : f32
    %44 = vector.broadcast %cst_24 : f32 to vector<2x1x1xf32>
    %45 = arith.divf %44, %43 : vector<2x1x1xf32>
    %46 = vector.broadcast %45 : vector<2x1x1xf32> to vector<2x16x16xf32>
    %47 = arith.mulf %35, %46 : vector<2x16x16xf32>
    %cst_25 = arith.constant dense<0.000000e+00> : vector<2x16xf32>
    %48 = vector.multi_reduction <add>, %39, %cst_25 [2] : vector<2x16x16xf32> to vector<2x16xf32>
    %49 = vector.shape_cast %48 : vector<2x16xf32> to vector<2x16x1xf32>
    %cst_26 = arith.constant dense<0.000000e+00> : vector<2x1xf32>
    %50 = vector.multi_reduction <add>, %49, %cst_26 [1] : vector<2x16x1xf32> to vector<2x1xf32>
    %51 = vector.shape_cast %50 : vector<2x1xf32> to vector<2x1x1xf32>
    %cst_27 = arith.constant 1.000000e+00 : f32
    %52 = vector.broadcast %cst_27 : f32 to vector<2x1x1xf32>
    %53 = arith.divf %52, %51 : vector<2x1x1xf32>
    %54 = vector.broadcast %53 : vector<2x1x1xf32> to vector<2x16x16xf32>
    %55 = arith.mulf %39, %54 : vector<2x16x16xf32>
    %cst_28 = arith.constant 9.99999993E-9 : f32
    %56 = vector.broadcast %cst_28 : f32 to vector<2x16x16xf32>
    %57 = arith.addf %47, %56 : vector<2x16x16xf32>
    %58 = arith.divf %55, %57 : vector<2x16x16xf32>
    %59 = math.log %58 : vector<2x16x16xf32>
    %60 = arith.mulf %55, %59 : vector<2x16x16xf32>
    %cst_29 = arith.constant dense<0.000000e+00> : vector<2x16xf32>
    %61 = vector.multi_reduction <add>, %60, %cst_29 [2] : vector<2x16x16xf32> to vector<2x16xf32>
    %62 = vector.shape_cast %61 : vector<2x16xf32> to vector<2x16x1xf32>
    %cst_30 = arith.constant dense<0.000000e+00> : vector<2x1xf32>
    %63 = vector.multi_reduction <add>, %62, %cst_30 [1] : vector<2x16x1xf32> to vector<2x1xf32>
    %64 = vector.shape_cast %63 : vector<2x1xf32> to vector<2x1x1xf32>
    %65 = arith.subf %47, %55 : vector<2x16x16xf32>
    %66 = vector.shape_cast %65 : vector<2x16x16xf32> to vector<32x16xf32>
    %c0_31 = arith.constant 0 : index
    %c0_32 = arith.constant 0 : index
    %67 = vector.load %arg7[%c0_31, %c0_32] : memref<16x16xf32, #tpu.memory_space<vmem>>, vector<16x16xf32>
    %cst_33 = arith.constant dense<0.000000e+00> : vector<32x16xf32>
    %68 = tpu.matmul %66, %67, %cst_33 {dimension_numbers = #tpu.dot_dimension_numbers<[1], [0], [0], [1], [0, 0, 1, 1], [], []>, precision = #tpu.contract_precision<fp32>} : vector<32x16xf32>, vector<16x16xf32>, vector<32x16xf32> -> vector<32x16xf32>
    %69 = math.absf %68 : vector<32x16xf32>
    %70 = vector.shape_cast %69 : vector<32x16xf32> to vector<2x16x16xf32>
    %cst_34 = arith.constant dense<0.000000e+00> : vector<2x16xf32>
    %71 = vector.multi_reduction <add>, %70, %cst_34 [2] : vector<2x16x16xf32> to vector<2x16xf32>
    %72 = vector.shape_cast %71 : vector<2x16xf32> to vector<2x16x1xf32>
    %cst_35 = arith.constant dense<0.000000e+00> : vector<2x1xf32>
    %73 = vector.multi_reduction <add>, %72, %cst_35 [1] : vector<2x16x1xf32> to vector<2x1xf32>
    %74 = vector.shape_cast %73 : vector<2x1xf32> to vector<2x1x1xf32>
    %c0_36 = arith.constant 0 : index
    %c0_37 = arith.constant 0 : index
    %c0_38 = arith.constant 0 : index
    %75 = vector.load %arg6[%c0_36, %c0_37, %c0_38] : memref<2x16x16xf32, #tpu.memory_space<vmem>>, vector<2x16x16xf32>
    "tpu.trace_start"() <{level = 10 : i32, message = "bkh,bhw->bkw"}> : () -> ()
    %cst_39 = arith.constant dense<0.000000e+00> : vector<2x16x16xf32>
    %76 = tpu.matmul %75, %65, %cst_39 {dimension_numbers = #tpu.dot_dimension_numbers<[2], [1], [1], [2], [0, 0, 0, 1, 1, 2], [0], [0]>, precision = #tpu.contract_precision<fp32>} : vector<2x16x16xf32>, vector<2x16x16xf32>, vector<2x16x16xf32> -> vector<2x16x16xf32>
    "tpu.trace_stop"() : () -> ()
    %77 = math.absf %76 : vector<2x16x16xf32>
    %cst_40 = arith.constant dense<0.000000e+00> : vector<2x16xf32>
    %78 = vector.multi_reduction <add>, %77, %cst_40 [2] : vector<2x16x16xf32> to vector<2x16xf32>
    %79 = vector.shape_cast %78 : vector<2x16xf32> to vector<2x16x1xf32>
    %cst_41 = arith.constant dense<0.000000e+00> : vector<2x1xf32>
    %80 = vector.multi_reduction <add>, %79, %cst_41 [1] : vector<2x16x1xf32> to vector<2x1xf32>
    %81 = vector.shape_cast %80 : vector<2x1xf32> to vector<2x1x1xf32>
    %82 = arith.addf %81, %74 : vector<2x1x1xf32>
    %cst_42 = arith.constant 5.000000e-01 : f32
    %83 = vector.broadcast %cst_42 : f32 to vector<2x1x1xf32>
    %84 = arith.mulf %83, %82 : vector<2x1x1xf32>
    %85 = tpu.iota {dimensions = array<i32: 1>} : vector<2x16x16xi32>
    %86 = tpu.iota {dimensions = array<i32: 2>} : vector<2x16x16xi32>
    %c16_i32 = arith.constant 16 : i32
    %87 = vector.broadcast %c16_i32 : i32 to vector<2x16x16xi32>
    %88 = arith.muli %85, %87 : vector<2x16x16xi32>
    %89 = arith.addi %88, %86 : vector<2x16x16xi32>
    %cst_43 = arith.constant dense<0xFF800000> : vector<2x16xf32>
    %90 = vector.multi_reduction <maximumf>, %47, %cst_43 [2] : vector<2x16x16xf32> to vector<2x16xf32>
    %91 = vector.shape_cast %90 : vector<2x16xf32> to vector<2x16x1xf32>
    %cst_44 = arith.constant dense<0xFF800000> : vector<2x1xf32>
    %92 = vector.multi_reduction <maximumf>, %91, %cst_44 [1] : vector<2x16x1xf32> to vector<2x1xf32>
    %93 = vector.shape_cast %92 : vector<2x1xf32> to vector<2x1x1xf32>
    %94 = vector.broadcast %93 : vector<2x1x1xf32> to vector<2x16x16xf32>
    %95 = arith.cmpf oeq, %47, %94 : vector<2x16x16xf32>
    %c256_i32 = arith.constant 256 : i32
    %96 = vector.broadcast %c256_i32 : i32 to vector<2x16x16xi32>
    %97 = arith.select %95, %89, %96 : vector<2x16x16xi1>, vector<2x16x16xi32>
    %cst_45 = arith.constant dense<2147483647> : vector<2x16xi32>
    %98 = vector.multi_reduction <minsi>, %97, %cst_45 [2] : vector<2x16x16xi32> to vector<2x16xi32>
    %99 = vector.shape_cast %98 : vector<2x16xi32> to vector<2x16x1xi32>
    %cst_46 = arith.constant dense<2147483647> : vector<2x1xi32>
    %100 = vector.multi_reduction <minsi>, %99, %cst_46 [1] : vector<2x16x1xi32> to vector<2x1xi32>
    %101 = vector.shape_cast %100 : vector<2x1xi32> to vector<2x1x1xi32>
    %c4_i32 = arith.constant 4 : i32
    %102 = vector.broadcast %c4_i32 : i32 to vector<2x1x1xi32>
    %103 = arith.shrsi %101, %102 : vector<2x1x1xi32>
    %c15_i32 = arith.constant 15 : i32
    %104 = vector.broadcast %c15_i32 : i32 to vector<2x1x1xi32>
    %105 = arith.andi %101, %104 : vector<2x1x1xi32>
    %106 = arith.sitofp %105 : vector<2x1x1xi32> to vector<2x1x1xf32>
    %cst_47 = arith.constant 0.0666666701 : f32
    %107 = vector.broadcast %cst_47 : f32 to vector<2x1x1xf32>
    %108 = arith.mulf %106, %107 : vector<2x1x1xf32>
    %109 = arith.sitofp %103 : vector<2x1x1xi32> to vector<2x1x1xf32>
    %cst_48 = arith.constant 0.0666666701 : f32
    %110 = vector.broadcast %cst_48 : f32 to vector<2x1x1xf32>
    %111 = arith.mulf %109, %110 : vector<2x1x1xf32>
    %cst_49 = arith.constant dense<0xFF800000> : vector<2x16xf32>
    %112 = vector.multi_reduction <maximumf>, %55, %cst_49 [2] : vector<2x16x16xf32> to vector<2x16xf32>
    %113 = vector.shape_cast %112 : vector<2x16xf32> to vector<2x16x1xf32>
    %cst_50 = arith.constant dense<0xFF800000> : vector<2x1xf32>
    %114 = vector.multi_reduction <maximumf>, %113, %cst_50 [1] : vector<2x16x1xf32> to vector<2x1xf32>
    %115 = vector.shape_cast %114 : vector<2x1xf32> to vector<2x1x1xf32>
    %116 = vector.broadcast %115 : vector<2x1x1xf32> to vector<2x16x16xf32>
    %117 = arith.cmpf oeq, %55, %116 : vector<2x16x16xf32>
    %c256_i32_51 = arith.constant 256 : i32
    %118 = vector.broadcast %c256_i32_51 : i32 to vector<2x16x16xi32>
    %119 = arith.select %117, %89, %118 : vector<2x16x16xi1>, vector<2x16x16xi32>
    %cst_52 = arith.constant dense<2147483647> : vector<2x16xi32>
    %120 = vector.multi_reduction <minsi>, %119, %cst_52 [2] : vector<2x16x16xi32> to vector<2x16xi32>
    %121 = vector.shape_cast %120 : vector<2x16xi32> to vector<2x16x1xi32>
    %cst_53 = arith.constant dense<2147483647> : vector<2x1xi32>
    %122 = vector.multi_reduction <minsi>, %121, %cst_53 [1] : vector<2x16x1xi32> to vector<2x1xi32>
    %123 = vector.shape_cast %122 : vector<2x1xi32> to vector<2x1x1xi32>
    %c4_i32_54 = arith.constant 4 : i32
    %124 = vector.broadcast %c4_i32_54 : i32 to vector<2x1x1xi32>
    %125 = arith.shrsi %123, %124 : vector<2x1x1xi32>
    %c15_i32_55 = arith.constant 15 : i32
    %126 = vector.broadcast %c15_i32_55 : i32 to vector<2x1x1xi32>
    %127 = arith.andi %123, %126 : vector<2x1x1xi32>
    %128 = arith.sitofp %127 : vector<2x1x1xi32> to vector<2x1x1xf32>
    %cst_56 = arith.constant 0.0666666701 : f32
    %129 = vector.broadcast %cst_56 : f32 to vector<2x1x1xf32>
    %130 = arith.mulf %128, %129 : vector<2x1x1xf32>
    %131 = arith.sitofp %125 : vector<2x1x1xi32> to vector<2x1x1xf32>
    %cst_57 = arith.constant 0.0666666701 : f32
    %132 = vector.broadcast %cst_57 : f32 to vector<2x1x1xf32>
    %133 = arith.mulf %131, %132 : vector<2x1x1xf32>
    %134 = arith.subf %108, %130 : vector<2x1x1xf32>
    %135 = arith.mulf %134, %134 : vector<2x1x1xf32>
    %136 = arith.subf %111, %133 : vector<2x1x1xf32>
    %137 = arith.mulf %136, %136 : vector<2x1x1xf32>
    %138 = arith.addf %135, %137 : vector<2x1x1xf32>
    %139 = math.sqrt %138 : vector<2x1x1xf32>
    %cst_58 = arith.constant 1.000000e-01 : f32
    %140 = vector.broadcast %cst_58 : f32 to vector<2x1x1xf32>
    %141 = arith.cmpf olt, %139, %140 : vector<2x1x1xf32>
    %142 = arith.extui %141 : vector<2x1x1xi1> to vector<2x1x1xi32>
    %143 = arith.sitofp %142 : vector<2x1x1xi32> to vector<2x1x1xf32>
    %144 = arith.mulf %64, %1 : vector<2x1x1xf32>
    %145 = vector.shape_cast %144 : vector<2x1x1xf32> to vector<1x2x1x1xf32>
    %cst_59 = arith.constant dense<0.000000e+00> : vector<1xf32>
    %146 = vector.multi_reduction <add>, %145, %cst_59 [1, 2, 3] : vector<1x2x1x1xf32> to vector<1xf32>
    %147 = vector.shape_cast %146 : vector<1xf32> to vector<1x1x1x1xf32>
    %148 = vector.extract %147[0, 0, 0, 0] : f32 from vector<1x1x1x1xf32>
    %149 = arith.mulf %84, %1 : vector<2x1x1xf32>
    %150 = vector.shape_cast %149 : vector<2x1x1xf32> to vector<1x2x1x1xf32>
    %cst_60 = arith.constant dense<0.000000e+00> : vector<1xf32>
    %151 = vector.multi_reduction <add>, %150, %cst_60 [1, 2, 3] : vector<1x2x1x1xf32> to vector<1xf32>
    %152 = vector.shape_cast %151 : vector<1xf32> to vector<1x1x1x1xf32>
    %153 = vector.extract %152[0, 0, 0, 0] : f32 from vector<1x1x1x1xf32>
    %154 = arith.mulf %143, %1 : vector<2x1x1xf32>
    %155 = vector.shape_cast %154 : vector<2x1x1xf32> to vector<1x2x1x1xf32>
    %cst_61 = arith.constant dense<0.000000e+00> : vector<1xf32>
    %156 = vector.multi_reduction <add>, %155, %cst_61 [1, 2, 3] : vector<1x2x1x1xf32> to vector<1xf32>
    %157 = vector.shape_cast %156 : vector<1xf32> to vector<1x1x1x1xf32>
    %158 = vector.extract %157[0, 0, 0, 0] : f32 from vector<1x1x1x1xf32>
    %159 = tpu.iota {dimensions = array<i32: 2>} : vector<1x1x128xi32>
    %c0_i32 = arith.constant 0 : i32
    %160 = vector.broadcast %c0_i32 : i32 to vector<1x1x128xi32>
    %161 = arith.cmpi eq, %159, %160 : vector<1x1x128xi32>
    %cst_62 = arith.constant 0.000000e+00 : f32
    %162 = vector.broadcast %148 : f32 to vector<1x1x128xf32>
    %163 = vector.broadcast %cst_62 : f32 to vector<1x1x128xf32>
    %164 = arith.select %161, %162, %163 : vector<1x1x128xi1>, vector<1x1x128xf32>
    %c1_i32 = arith.constant 1 : i32
    %165 = vector.broadcast %c1_i32 : i32 to vector<1x1x128xi32>
    %166 = arith.cmpi eq, %159, %165 : vector<1x1x128xi32>
    %cst_63 = arith.constant 0.000000e+00 : f32
    %167 = vector.broadcast %153 : f32 to vector<1x1x128xf32>
    %168 = vector.broadcast %cst_63 : f32 to vector<1x1x128xf32>
    %169 = arith.select %166, %167, %168 : vector<1x1x128xi1>, vector<1x1x128xf32>
    %170 = arith.addf %164, %169 : vector<1x1x128xf32>
    %c2_i32 = arith.constant 2 : i32
    %171 = vector.broadcast %c2_i32 : i32 to vector<1x1x128xi32>
    %172 = arith.cmpi eq, %159, %171 : vector<1x1x128xi32>
    %cst_64 = arith.constant 0.000000e+00 : f32
    %173 = vector.broadcast %158 : f32 to vector<1x1x128xf32>
    %174 = vector.broadcast %cst_64 : f32 to vector<1x1x128xf32>
    %175 = arith.select %172, %173, %174 : vector<1x1x128xi1>, vector<1x1x128xf32>
    %176 = arith.addf %170, %175 : vector<1x1x128xf32>
    %c0_65 = arith.constant 0 : index
    %c0_66 = arith.constant 0 : index
    %c0_67 = arith.constant 0 : index
    %177 = vector.load %arg8[%c0_65, %c0_66, %c0_67] : memref<1x1x128xf32, #tpu.memory_space<vmem>>, vector<1x1x128xf32>
    tpu.vector_store %arg8[%c0_65, %c0_66, %c0_67], %176 {strides = array<i32>} : memref<1x1x128xf32, #tpu.memory_space<vmem>>, vector<1x1x128xf32>,
    return
  }
  func.func @transform_0(%arg0: i32) -> (i32, i32, i32) {
    %c0_i32 = arith.constant 0 : i32
    %c0_i32_0 = arith.constant 0 : i32
    %c0_i32_1 = arith.constant 0 : i32
    return %arg0, %c0_i32, %c0_i32_0 : i32, i32, i32
  }
  func.func @transform_1(%arg0: i32) -> (i32, i32, i32) {
    %c0_i32 = arith.constant 0 : i32
    %c0_i32_0 = arith.constant 0 : i32
    %c0_i32_1 = arith.constant 0 : i32
    return %arg0, %c0_i32, %c0_i32_0 : i32, i32, i32
  }
  func.func @transform_2(%arg0: i32) -> (i32, i32, i32) {
    %c0_i32 = arith.constant 0 : i32
    %c0_i32_0 = arith.constant 0 : i32
    %c0_i32_1 = arith.constant 0 : i32
    return %arg0, %c0_i32, %c0_i32_0 : i32, i32, i32
  }
  func.func @transform_3(%arg0: i32) -> (i32, i32, i32) {
    %c0_i32 = arith.constant 0 : i32
    %c0_i32_0 = arith.constant 0 : i32
    %c0_i32_1 = arith.constant 0 : i32
    return %arg0, %c0_i32, %c0_i32_0 : i32, i32, i32
  }
  func.func @transform_4(%arg0: i32) -> (i32, i32, i32) {
    %c0_i32 = arith.constant 0 : i32
    %c0_i32_0 = arith.constant 0 : i32
    %c0_i32_1 = arith.constant 0 : i32
    return %arg0, %c0_i32, %c0_i32_0 : i32, i32, i32
  }
  func.func @transform_5(%arg0: i32) -> (i32, i32, i32) {
    %c0_i32 = arith.constant 0 : i32
    %c0_i32_0 = arith.constant 0 : i32
    %c0_i32_1 = arith.constant 0 : i32
    %c0_i32_2 = arith.constant 0 : i32
    return %c0_i32, %c0_i32_0, %c0_i32_1 : i32, i32, i32
  }
  func.func @transform_6(%arg0: i32) -> (i32, i32) {
    %c0_i32 = arith.constant 0 : i32
    %c0_i32_0 = arith.constant 0 : i32
    %c0_i32_1 = arith.constant 0 : i32
    return %c0_i32, %c0_i32_0 : i32, i32
  }
  func.func @transform_7(%arg0: i32) -> (i32, i32, i32) {
    %c0_i32 = arith.constant 0 : i32
    %c0_i32_0 = arith.constant 0 : i32
    %c0_i32_1 = arith.constant 0 : i32
    return %arg0, %c0_i32, %c0_i32_0 : i32, i32, i32
  }
}

</mosaic_0001>

<bundles_post_ra>
// kernel: tpu_custom_call.1
= control target key start
LH: loop header
LB: loop body
LE: loop exit
PB: predicated region body
PF: predicated region fallthrough
CT: control target
= control target key end

     0   :  { %12 = vsyncpa [#allocation3], 0  ;;  %s4463_s0 = inlined_call_operand.vmem [shape: f32[2,1,1], index: 0, kind: input, shape index: {}]   ;;  %s4464_s1 = inlined_call_operand.vmem [shape: f32[2,1,1], index: 1, kind: input, shape index: {}]   ;;  %s4465_s2 = inlined_call_operand.vmem [shape: f32[2,8,1], index: 2, kind: input, shape index: {}]   ;;  %s4466_s3 = inlined_call_operand.hbm [shape: f32[2,1,8], index: 3, kind: input, shape index: {}]   ;;  %s4467_s4 = inlined_call_operand.hbm [shape: f32[2,16,16], index: 4, kind: input, shape index: {}]   ;;  %s4468_s5 = inlined_call_operand.vmem [shape: f32[2,16,16], index: 5, kind: input, shape index: {}]   ;;  %s4469_s6 = inlined_call_operand.hbm [shape: f32[16,16], index: 6, kind: input, shape index: {}]   ;;  %s4470_s7 = inlined_call_operand.hbm [shape: f32[1,1,128], index: 7, kind: output, shape index: {}]  }
   0x1   :  { %13 = vsyncpa [#allocation6], 0 }
   0x2   :  { %14 = vsyncpa [#allocation4], 0  ;;  %s3818_s24 = smov [#allocation5]  }
   0x3   :  { %s38_s25 = sshll.u32 %s3818_s24, 4  ;;  %s39_s25 = int_to_ptr.vmem [resolvable:$true] %s38_s25 }
   0x4   :  { %s3740_s26 = scalar_lea.vmem %s39_s25, 512  ;;  %p3745_p1 = scmp.lt.s32.totalorder %s39_s25, %s39_s25 }
   0x5   :  { %p3741_p0 = scmp.ne.s32.totalorder %s39_s25, %s3740_s26  ;;  %p3746_p2 = scmp.lt.s32.totalorder %s3740_s26, %s3740_s26 }
   0x7   :  { %p3747_p3 = por %p3746_p2, %p3745_p1 }
   0x9   :  { %p3748_p4 = pnand %p3747_p3, %p3741_p0 }
   0xb   :  { %3751 = shalt.err (!%p3748_p4)
}
   0xc   :  { %s3819_s27 = smov 128   ;;  %s3820_s28 = smov 8  }
   0xd   :  { %44 = dma.hbm_to_vmem [thread:$0]  %s4467_s4, 512, %s39_s25, [#allocation6], %s3819_s27, %s3819_s27, %s3820_s28  }
   0xe   :  { %s3821_s8 = smov [#allocation2]  }
   0xf   :  { %s26_s9 = sshll.u32 %s3821_s8, 4  ;;  %s27_s9 = int_to_ptr.vmem [resolvable:$true] %s26_s9 }
  0x10   :  { %s3760_s10 = scalar_lea.vmem %s27_s9, 32  ;;  %p3765_p6 = scmp.lt.s32.totalorder %s27_s9, %s27_s9 }
  0x11   :  { %p3761_p5 = scmp.ne.s32.totalorder %s27_s9, %s3760_s10  ;;  %p3766_p7 = scmp.lt.s32.totalorder %s3760_s10, %s3760_s10 }
  0x13   :  { %p3767_p8 = por %p3766_p7, %p3765_p6 }
  0x15   :  { %p3768_p9 = pnand %p3767_p8, %p3761_p5 }
  0x17   :  { %3771 = shalt.err (!%p3768_p9)
}
  0x18   :  { %s3822_s11 = smov 16   ;;  %s3823_s12 = smov 1  }
  0x19   :  { %32 = dma.hbm_to_vmem [thread:$0]  %s4466_s3, 32, %s27_s9, [#allocation3], %s3822_s11, %s3822_s11, %s3823_s12  }
  0x1a   :  { %s3824_s15 = smov [#allocation7]  }
  0x1b   :  { %s52_s16 = sshll.u32 %s3824_s15, 4  ;;  %s53_s16 = int_to_ptr.vmem [resolvable:$true] %s52_s16 }
  0x1c   :  { %s3780_s4 = scalar_lea.vmem %s53_s16, 256  ;;  %p3785_p11 = scmp.lt.s32.totalorder %s53_s16, %s53_s16 }
  0x1d   :  { %p3781_p10 = scmp.ne.s32.totalorder %s53_s16, %s3780_s4  ;;  %p3786_p12 = scmp.lt.s32.totalorder %s3780_s4, %s3780_s4 }
  0x1f   :  { %p3787_p13 = por %p3786_p12, %p3785_p11 }
  0x21   :  { %p3788_p0 = pnand %p3787_p13, %p3781_p10 }
  0x23   :  { %3791 = shalt.err (!%p3788_p0)
}
  0x24   :  { %58 = dma.hbm_to_vmem [thread:$0]  %s4469_s6, 256, %s53_s16, [#allocation6], %s3819_s27, %s3819_s27, %s3820_s28  }
  0x25   :  { %3812 = dma.done.wait [#allocation3], 32  }
  0x26   :  { %3813 = vsyncadd [#allocation3], 4294967264 }
  0x27   :  { %3814 = dma.done.wait [#allocation6], 768  }
  0x28   :  { %3815 = vsyncadd [#allocation6], 4294966528  ;;  %v80_v0 = vlaneseq  ;;  %v3825_v1 = vmov 0   ;;  %v76_v7 = vld [vmem:[%s4465_s2] sm:$0xff]  ;;  %v77_v11 = vld [vmem:[%s4465_s2 + $0x8] sm:$0xff]  ;;  %vm149_vm0 = vcmask 64512  }
  0x29   :  { %3690 = vset.pattern.permute.xlu0 %v3825_v1  ;;  %3691 = vset.pattern.permute.xlu1 %v3825_v1  ;;  %v3346_v8 = vld [vmem:[%s4463_s0] ss:$0 sm:$0xff]  ;;  %v3347_v12 = vld [vmem:[%s4463_s0 + $0x1] ss:$0 sm:$0xff]  ;;  %v73_v47 = vld [vmem:[#allocation5 + $0x8] sm:$0xff]  ;;  %vm1174_vm1 = vcmask 130048  }
  0x2a   :  { %v3877_v2 = vshrl.u32 %v80_v0, 7  ;;  %93 = vperm.xlu0 %3690, %v76_v7   ;;  %1151 = vperm.xlu1 %3691, %v3346_v8   ;;  %v3344_v9 = vld [vmem:[#allocation2] ss:$0 sm:$0xff]  ;;  %v3345_v14 = vld [vmem:[#allocation2 + $0x1] ss:$0 sm:$0xff]  ;;  %v3911_v42 = vand.u32 127, %v80_v0 }
  0x2b   :  { %v72_v48 = vld [vmem:[#allocation5] sm:$0xff]  ;;  %v75_v58 = vld [vmem:[#allocation5 + $0x18] sm:$0xff]  ;;  %v74_v59 = vld [vmem:[#allocation5 + $0x10] sm:$0xff]  ;;  %s3827_s13 = smov [#allocation8]  }
  0x2c   :  { %v3880_v3 = vadd.s32 8, %v3877_v2  ;;  %v87_v4 = vcvt.s32.f32 %v3877_v2  ;;  %4475 = vst [vmem:[#allocation12_spill] sm:$0xff] %v3911_v42  ;;  %v82_v44 = vcvt.s32.f32 %v3911_v42  ;;  %s3334_s14 = sshll.u32 %s3827_s13, 4  ;;  %s3335_s14 = int_to_ptr.vmem [resolvable:$true] %s3334_s14 }
  0x2d   :  { %s3792_s15 = scalar_lea.vmem %s3335_s14, 16  ;;  %s3796_s16 = scalar_lea.vmem %s3335_s14, 32 }
  0x2e   :  { %v88_v5 = vcvt.s32.f32 %v3880_v3  ;;  %v89_v6 = vmul.f32 0.06666667, %v87_v4  ;;  %98 = vperm.xlu0 %3690, %v77_v11   ;;  %1155 = vperm.xlu1 %3691, %v3347_v12   ;;  %v83_v46 = vmul.f32 0.06666667, %v82_v44  ;;  %p3793_p1 = scmp.ne.s32.totalorder %s3335_s14, %s3792_s15  ;;  %p3797_p2 = scmp.lt.s32.totalorder %s3335_s14, %s3335_s14 }
  0x2f   :  { %p3798_p3 = scmp.lt.s32.totalorder %s3796_s16, %s3792_s15 }
  0x30   :  { %v90_v10 = vmul.f32 0.06666667, %v88_v5  ;;  %v125_v13 = vsub.f32 %v89_v6, %v3344_v9  ;;  %v127_v16 = vsub.f32 %v89_v6, %v3345_v14 }
  0x31   :  { %p3799_p4 = por %p3798_p3, %p3797_p2 }
  0x32   :  { %v126_v15 = vsub.f32 %v90_v10, %v3344_v9  ;;  %v129_v17 = vmul.f32 %v125_v13, %v125_v13  ;;  %v131_v19 = vmul.f32 %v127_v16, %v127_v16  ;;  %v128_v40 = vsub.f32 %v90_v10, %v3345_v14 }
  0x33   :  { %p3800_p5 = pnand %p3799_p4, %p3793_p1 }
  0x34   :  { %v130_v18 = vmul.f32 %v126_v15, %v126_v15  ;;  %v133_v20 = vsub.f32 0.0, %v129_v17  ;;  %v135_v22 = vsub.f32 0.0, %v131_v19  ;;  %v132_v41 = vmul.f32 %v128_v40, %v128_v40 }
  0x36   :  { %v134_v21 = vsub.f32 0.0, %v130_v18  ;;  %v137_v23 = vmul.f32 50.0, %v133_v20  ;;  %v139_v25 = vmul.f32 50.0, %v135_v22  ;;  %v136_v43 = vsub.f32 0.0, %v132_v41 }
  0x38   :  { %v138_v24 = vmul.f32 50.0, %v134_v21  ;;  %v141_v26 = vmul.f32 1.442695, %v137_v23  ;;  %v145_v28 = vmul.f32 1.442695, %v139_v25  ;;  %v140_v45 = vmul.f32 50.0, %v136_v43 }
  0x3a   :  { %v143_v27 = vmul.f32 1.442695, %v138_v24  ;;  %3692 = vpow2.f32 %v141_v26  ;;  %v147_v49 = vmul.f32 1.442695, %v140_v45 }
  0x3c   :  { %3694 = vpow2.f32 %v143_v27 }
  0x3d   :  { %3696 = vpow2.f32 %v145_v28 }
  0x3e   :  { %3698 = vpow2.f32 %v147_v49 }
  0x47   :  { %v3693_v29 = vpop.eup %3692 }
  0x48   :  { %v151_v31 = vsel %vm149_vm0, %v3693_v29, 0 }
  0x49   :  { %v3695_v30 = vpop.eup %3694  ;;  %v3897_v33 = vand.u32 4294901760, %v151_v31 }
  0x4a   :  { %v3697_v32 = vpop.eup %3696  ;;  %v154_v34 = vsel %vm149_vm0, %v3695_v30, 0 }
  0x4b   :  { %v3901_v35 = vsel %vm149_vm0, %v3697_v32, 0  ;;  %v3904_v36 = vsub.f32 %v151_v31, %v3897_v33  ;;  %3477 = vmatprep.mubr.f32.mxu1 %v3897_v33  ;;  %v3934_v12 = vand.u32 4294901760, %v154_v34  ;;  %v3699_v18 = vpop.eup %3698 }
  0x4c   :  { %v649_v20 = vsel %vm149_vm0, %v3699_v18, 0  ;;  %v3943_v22 = vand.u32 4294901760, %v3901_v35 }
  0x4d   :  { %v224_v37 = vand.u32 4294901760, %v3904_v36  ;;  %v233_v17 = vsub.f32 %v154_v34, %v3934_v12  ;;  %v3945_v23 = vand.u32 4294901760, %v649_v20 }
  0x4e   :  { %v718_v27 = vsub.f32 %v3901_v35, %v3943_v22 }
  0x4f   :  { %v225_v38 = vsub.f32 %v3904_v36, %v224_v37  ;;  %v234_v19 = vand.u32 4294901760, %v233_v17  ;;  %v728_v28 = vsub.f32 %v649_v20, %v3945_v23 }
  0x50   :  { %v719_v34 = vand.u32 4294901760, %v718_v27 }
  0x51   :  { %v226_v39 = vand.u32 4294901760, %v225_v38  ;;  %v235_v21 = vsub.f32 %v233_v17, %v234_v19  ;;  %v729_v38 = vand.u32 4294901760, %v728_v28 }
  0x52   :  { %v720_v41 = vsub.f32 %v718_v27, %v719_v34 }
  0x53   :  { %3472 = vmatprep.mubr.f32.mxu0 %v226_v39  ;;  %v236_v26 = vand.u32 4294901760, %v235_v21  ;;  %v730_v44 = vsub.f32 %v728_v28, %v729_v38 }
  0x54   :  { %v721_v45 = vand.u32 4294901760, %v720_v41 }
  0xa5   :  { %v94_v50 = vpop.permute.xlu0 %93  ;;  %v3914_v51 = vpop.permute.xlu1 %1151 }
  0xa6   :  { %v101_v52 = vsub.f32 %v83_v46, %v94_v50  ;;  %v1159_v53 = vmul.f32 %v3914_v51, %v73_v47  ;;  %v1158_v54 = vmul.f32 %v3914_v51, %v72_v48  ;;  %v731_v47 = vand.u32 4294901760, %v730_v44 }
  0xa8   :  { %v103_v55 = vmul.f32 %v101_v52, %v101_v52  ;;  %v3918_v56 = vadd.f32 1e-08, %v1159_v53  ;;  %v3920_v57 = vadd.f32 1e-08, %v1158_v54 }
  0xa9   :  { %v99_v60 = vpop.permute.xlu0 %98  ;;  %v3922_v61 = vpop.permute.xlu1 %1155 }
  0xaa   :  { %v105_v62 = vsub.f32 0.0, %v103_v55  ;;  %v102_v63 = vsub.f32 %v83_v46, %v99_v60  ;;  %v1178_v0 = vsel %vm1174_vm1, %v3918_v56, 0.0  ;;  %v1175_v1 = vsel %vm1174_vm1, %v3920_v57, 0.0 }
  0xab   :  { %1179 = vadd.xlane.f32.xlu1 %v1178_v0  ;;  %1176 = vadd.xlane.f32.xlu0 %v1175_v1  ;;  %v1161_v4 = vmul.f32 %v3922_v61, %v75_v58  ;;  %v1160_v5 = vmul.f32 %v3922_v61, %v74_v59 }
  0xac   :  { %v107_v6 = vmul.f32 50.0, %v105_v62  ;;  %v104_v7 = vmul.f32 %v102_v63, %v102_v63 }
  0xad   :  { %v3930_v8 = vadd.f32 1e-08, %v1161_v4  ;;  %v3932_v9 = vadd.f32 1e-08, %v1160_v5 }
  0xae   :  { %v109_v10 = vmul.f32 1.442695, %v107_v6  ;;  %v106_v11 = vsub.f32 0.0, %v104_v7 }
  0xaf   :  { %v1184_v13 = vsel %vm1174_vm1, %v3930_v8, 0.0  ;;  %v1181_v14 = vsel %vm1174_vm1, %v3932_v9, 0.0 }
  0xb0   :  { %3700 = vpow2.f32 %v109_v10  ;;  %v108_v15 = vmul.f32 50.0, %v106_v11  ;;  %1185 = vadd.xlane.f32.xlu0 %v1184_v13  ;;  %1182 = vadd.xlane.f32.xlu1 %v1181_v14 }
  0xb2   :  { %v111_v16 = vmul.f32 1.442695, %v108_v15 }
  0xb4   :  { %3702 = vpow2.f32 %v111_v16 }
  0xbd   :  { %v3701_v24 = vpop.eup %3700 }
  0xbe   :  { %v187_v25 = vand.u32 4294901760, %v3701_v24 }
  0xc0   :  { %3470 = vmatprep.subr.mxu0 %v187_v25  ;;  %v274_v29 = vsub.f32 %v3701_v24, %v187_v25 }
  0xc1   :  { %v3703_v30 = vpop.eup %3702  ;;  %3471 = vmatpush3.msra.mxu0 %v187_v25 }
  0xc2   :  { %v682_v31 = vand.u32 4294901760, %v3703_v30  ;;  %3473 = vmatmul.mubr.f32.vlgmr.msra.gmra.mxu0 %v236_v26  ;;  %3480 = vmatprep.subr.mxu0 %v274_v29  ;;  %v275_v32 = vand.u32 4294901760, %v274_v29 }
  0xc3   :  { %3481 = vmatpush3.msra.mxu0 %v274_v29  ;;  %3482 = vmatprep.mubr.f32.mxu0 %v3904_v36 }
  0xc4   :  { %3490 = vmatprep.subr.mxu0 %v275_v32  ;;  %v276_v39 = vsub.f32 %v274_v29, %v275_v32  ;;  %v769_v40 = vsub.f32 %v3703_v30, %v682_v31 }
  0xc6   :  { %3483 = vmatmul.mubr.f32.vlgmr.msra.gmra.mxu0 %v233_v17  ;;  %v277_v35 = vand.u32 4294901760, %v276_v39  ;;  %v770_v43 = vand.u32 4294901760, %v769_v40 }
  0xc7   :  { %3491 = vmatpush3.msra.mxu0 %v275_v32  ;;  %3492 = vmatprep.mubr.f32.mxu0 %v3897_v33 }
  0xc8   :  { %3500 = vmatprep.subr.mxu0 %v682_v31  ;;  %3475 = vmatprep.subr.mxu1 %v277_v35  ;;  %v771_v46 = vsub.f32 %v769_v40, %v770_v43 }
  0xc9   :  { %3476 = vmatpush3.msra.mxu1 %v277_v35 }
  0xca   :  { %3478 = vmatmul.mubr.f32.vlgmr.msra.gmra.mxu1 %v3934_v12  ;;  %3485 = vmatprep.subr.mxu1 %v187_v25  ;;  %v772_v48 = vand.u32 4294901760, %v771_v46 }
  0xcb   :  { %3493 = vmatmul.mubr.f32.vlgmr.msra.gmra.mxu0 %v3934_v12  ;;  %3486 = vmatpush3.msra.mxu1 %v187_v25 }
  0xcc   :  { %3501 = vmatpush3.msra.mxu0 %v682_v31  ;;  %3495 = vmatprep.subr.mxu1 %v187_v25 }
  0xcd   :  { %3510 = vmatprep.subr.mxu0 %v769_v40  ;;  %3487 = vmatprep.mubr.f32.mxu1 %v224_v37 }
  0xce   :  { %3502 = vmatprep.mubr.f32.mxu0 %v721_v45  ;;  %3488 = vmatmul.mubr.f32.vlgmr.msra.gmra.mxu1 %v234_v19 }
  0xcf   :  { %3496 = vmatpush3.msra.mxu1 %v187_v25  ;;  %3503 = vmatmul.mubr.f32.vlgmr.msra.gmra.mxu0 %v731_v47 }
  0xd0   :  { %3511 = vmatpush3.msra.mxu0 %v769_v40  ;;  %3505 = vmatprep.subr.mxu1 %v772_v48 }
  0xd1   :  { %3520 = vmatprep.subr.mxu0 %v770_v43  ;;  %3497 = vmatprep.mubr.f32.mxu1 %v3897_v33 }
  0xd2   :  { %3512 = vmatprep.mubr.f32.mxu0 %v718_v27  ;;  %3498 = vmatmul.mubr.f32.vlgmr.msra.gmra.mxu1 %v3934_v12 }
  0xd3   :  { %3506 = vmatpush3.msra.mxu1 %v772_v48  ;;  %3513 = vmatmul.mubr.f32.vlgmr.msra.gmra.mxu0 %v728_v28 }
  0xd4   :  { %3521 = vmatpush3.msra.mxu0 %v770_v43  ;;  %3515 = vmatprep.subr.mxu1 %v682_v31 }
  0xd5   :  { %3507 = vmatprep.mubr.f32.mxu1 %v3943_v22  ;;  %3522 = vmatprep.mubr.f32.mxu0 %v3943_v22 }
  0xd6   :  { %3508 = vmatmul.mubr.f32.vlgmr.msra.gmra.mxu1 %v3945_v23 }
  0xd7   :  { %3516 = vmatpush3.msra.mxu1 %v682_v31  ;;  %3517 = vmatprep.mubr.f32.mxu1 %v719_v34 }
  0xd8   :  { %3525 = vmatprep.subr.mxu1 %v682_v31  ;;  %3523 = vmatmul.mubr.f32.vlgmr.msra.gmra.mxu0 %v3945_v23 }
  0xda   :  { %3518 = vmatmul.mubr.f32.vlgmr.msra.gmra.mxu1 %v729_v38 }
  0xdb   :  { %3526 = vmatpush3.msra.mxu1 %v682_v31  ;;  %3527 = vmatprep.mubr.f32.mxu1 %v3943_v22 }
  0xde   :  { %3528 = vmatmul.mubr.f32.vlgmr.msra.gmra.mxu1 %v3945_v23 }
 0x134   :  { %v1177_v33 = vpop.xlane.xlu0 %1176  ;;  %v1180_v36 = vpop.xlane.xlu1 %1179 }
 0x135   :  { %v1187_v37 = vadd.f32 %v1180_v36, %v1177_v33 }
 0x137   :  { %v1188_v53 = vrot.slane %v1187_v37, 4 }
 0x139   :  { %v1186_v49 = vpop.xlane.xlu0 %1185  ;;  %v1183_v50 = vpop.xlane.xlu1 %1182  ;;  %v1189_v55 = vadd.f32 %v1188_v53, %v1187_v37 }
 0x13a   :  { %v1194_v52 = vadd.f32 %v1186_v49, %v1183_v50 }
 0x13b   :  { %v1190_v62 = vrot.slane %v1189_v55, 2 }
 0x13c   :  { %v1195_v54 = vrot.slane %v1194_v52, 4 }
 0x13d   :  { %v1191_v4 = vadd.f32 %v1190_v62, %v1189_v55 }
 0x13e   :  { %v1196_v59 = vadd.f32 %v1195_v54, %v1194_v52 }
 0x13f   :  { %v1192_v12 = vrot.slane %v1191_v4, 1 }
 0x140   :  { %v1197_v0 = vrot.slane %v1196_v59, 2 }
 0x141   :  { %v1193_v22 = vadd.f32 %v1192_v12, %v1191_v4 }
 0x142   :  { %v1198_v10 = vadd.f32 %v1197_v0, %v1196_v59 }
 0x143   :  { %3704 = vrcp.f32 %v1193_v22 }
 0x144   :  { %v1199_v20 = vrot.slane %v1198_v10, 1 }
 0x146   :  { %v1200_v30 = vadd.f32 %v1199_v20, %v1198_v10 }
 0x148   :  { %3706 = vrcp.f32 %v1200_v30 }
 0x182   :  { %v3474_v58 = vpop.f32.mrf.mxu0 }
 0x184   :  { %v228_v60 = vpop.f32.mrf.mxu0 }
 0x186   :  { %v3484_v63 = vpop.f32.mrf.mxu0 }
 0x188   :  { %v394_v1 = vpop.f32.mrf.mxu0 }
 0x18a   :  { %v3479_v5 = vpop.f32.mrf.mxu1 }
 0x18b   :  { %v321_v6 = vadd.f32 %v3479_v5, %v3474_v58  ;;  %v3494_v7 = vpop.f32.mrf.mxu0 }
 0x18c   :  { %v314_v11 = vpop.f32.mrf.mxu1 }
 0x18d   :  { %v402_v13 = vadd.f32 %v3484_v63, %v321_v6  ;;  %v315_v14 = vadd.f32 %v314_v11, %v228_v60  ;;  %v557_v15 = vpop.f32.mrf.mxu0  ;;  %v3705_v63 = vpop.eup %3704 }
 0x18e   :  { %v3489_v16 = vpop.f32.mrf.mxu1  ;;  %v3707_v4 = vpop.eup %3706  ;;  %v3988_v11 = vmul.f32 %v3705_v63, %v3920_v57 }
 0x18f   :  { %v395_v17 = vadd.f32 %v394_v1, %v315_v14  ;;  %v484_v18 = vadd.f32 %v3489_v16, %v402_v13  ;;  %v3504_v19 = vpop.f32.mrf.mxu0  ;;  %v3993_v12 = vmul.f32 %v3707_v4, %v3930_v8  ;;  %v1297_v8 = vld [vmem:[#allocation7] sm:$0xff] }
 0x190   :  { %v475_v21 = vpop.f32.mrf.mxu1  ;;  %v2987_v13 = vsel %vm1174_vm1, %v3988_v11, -inf }
 0x191   :  { %v564_v23 = vadd.f32 %v3494_v7, %v484_v18  ;;  %v476_v24 = vadd.f32 %v475_v21, %v395_v17  ;;  %v723_v25 = vpop.f32.mrf.mxu0  ;;  %v3983_v7 = vmul.f32 %v3705_v63, %v3918_v56  ;;  %v3998_v56 = vmul.f32 %v3707_v4, %v3932_v9 }
 0x192   :  { %v3499_v26 = vpop.f32.mrf.mxu1  ;;  %v2996_v14 = vsel %vm1174_vm1, %v3993_v12, -inf  ;;  %v4009_v18 = vand.u32 4294901760, %v1297_v8 }
 0x193   :  { %v558_v27 = vadd.f32 %v557_v15, %v476_v24  ;;  %v642_v28 = vadd.f32 %v3499_v26, %v564_v23  ;;  %v3514_v29 = vpop.f32.mrf.mxu0  ;;  %v2993_v57 = vsel %vm1174_vm1, %v3998_v56, -inf  ;;  %v1298_v15 = vld [vmem:[#allocation7 + $0x8] sm:$0xff] }
 0x194   :  { %v635_v31 = vpop.f32.mrf.mxu1  ;;  %v4004_v16 = vand.u32 4294901760, %v1298_v15 }
 0x195   :  { %v1167_v32 = vmul.f32 %v3914_v51, %v642_v28  ;;  %v636_v34 = vadd.f32 %v635_v31, %v558_v27  ;;  %v889_v39 = vpop.f32.mrf.mxu0 }
 0x196   :  { %v3509_v38 = vpop.f32.mrf.mxu1  ;;  %v4007_v17 = vsub.f32 %v1298_v15, %v4004_v16  ;;  %3530 = vmatprep.subr.mxu0 %v4004_v16 }
 0x197   :  { %v1166_v40 = vmul.f32 %v3914_v51, %v636_v34  ;;  %v816_v35 = vadd.f32 %v3509_v38, %v3504_v19  ;;  %v3966_v41 = vadd.f32 1e-08, %v1167_v32  ;;  %3531 = vmatpush3.msra.mxu0 %v4004_v16  ;;  %v4017_v19 = vsub.f32 %v1297_v8, %v4009_v18 }
 0x198   :  { %v809_v43 = vpop.f32.mrf.mxu1  ;;  %v3524_v33 = vpop.f32.mrf.mxu0  ;;  %v4014_v9 = vand.u32 4294901760, %v4007_v17  ;;  %3532 = vmatprep.subr.mxu0 %v4009_v18 }
 0x199   :  { %v897_v44 = vadd.f32 %v3514_v29, %v816_v35  ;;  %v810_v45 = vadd.f32 %v809_v43, %v723_v25  ;;  %v1212_v46 = vsel %vm1174_vm1, %v3966_v41, 0.0  ;;  %v3970_v47 = vadd.f32 1e-08, %v1166_v40  ;;  %3533 = vmatpush3.msra.mxu0 %v4009_v18 }
 0x19a   :  { %v3519_v48 = vpop.f32.mrf.mxu1  ;;  %1213 = vadd.xlane.f32.xlu0 %v1212_v46  ;;  %v1052_v53 = vpop.f32.mrf.mxu0  ;;  %v1450_v20 = vsub.f32 %v4007_v17, %v4014_v9  ;;  %v4024_v21 = vand.u32 4294901760, %v4017_v19  ;;  %3550 = vmatprep.subr.mxu0 %v4007_v17 }
 0x19b   :  { %v890_v36 = vadd.f32 %v889_v39, %v810_v45  ;;  %v979_v37 = vadd.f32 %v3519_v48, %v897_v44  ;;  %v1209_v52 = vsel %vm1174_vm1, %v3970_v47, 0.0 }
 0x19c   :  { %v970_v49 = vpop.f32.mrf.mxu1  ;;  %v1451_v22 = vand.u32 4294901760, %v1450_v20  ;;  %v1457_v23 = vsub.f32 %v4017_v19, %v4024_v21 }
 0x19d   :  { %v1059_v50 = vadd.f32 %v3524_v33, %v979_v37  ;;  %v971_v51 = vadd.f32 %v970_v49, %v890_v36 }
 0x19e   :  { %v3529_v54 = vpop.f32.mrf.mxu1  ;;  %1210 = vadd.xlane.f32.xlu0 %v1209_v52  ;;  %3540 = vmatprep.subr.mxu1 %v1451_v22  ;;  %v1458_v24 = vand.u32 4294901760, %v1457_v23 }
 0x19f   :  { %v1053_v55 = vadd.f32 %v1052_v53, %v971_v51  ;;  %v1137_v58 = vadd.f32 %v3529_v54, %v1059_v50  ;;  %3541 = vmatpush3.msra.mxu1 %v1451_v22 }
 0x1a0   :  { %v1130_v59 = vpop.f32.mrf.mxu1  ;;  %3542 = vmatprep.subr.mxu1 %v1458_v24 }
 0x1a1   :  { %v1169_v60 = vmul.f32 %v3922_v61, %v1137_v58  ;;  %v1131_v62 = vadd.f32 %v1130_v59, %v1053_v55  ;;  %3543 = vmatpush3.msra.mxu1 %v1458_v24 }
 0x1a2   :  { %3560 = vmatprep.subr.mxu1 %v4004_v16 }
 0x1a3   :  { %v1168_v0 = vmul.f32 %v3922_v61, %v1131_v62  ;;  %v3976_v1 = vadd.f32 1e-08, %v1169_v60  ;;  %v2990_v61 = vsel %vm1174_vm1, %v3983_v7, -inf  ;;  %v2984_v60 = vmul.u32 16, %v3880_v3 }
 0x1a5   :  { %v1218_v5 = vsel %vm1174_vm1, %v3976_v1, 0.0  ;;  %v3980_v6 = vadd.f32 1e-08, %v1168_v0  ;;  %v2983_v0 = vmul.u32 16, %v3877_v2 }
 0x1a6   :  { %1219 = vadd.xlane.f32.xlu0 %v1218_v5 }
 0x1a7   :  { %v1215_v10 = vsel %vm1174_vm1, %v3980_v6, 0.0  ;;  %v4043_v3 = vadd.s32 %v2983_v0, %v3911_v42 }
 0x1a8   :  { %1216 = vadd.xlane.f32.xlu1 %v1215_v10 }
 0x1aa   :  { %2991 = vmax.xlane.f32.xlu0 %v2990_v61  ;;  %v4033_v61 = vadd.s32 %v2984_v60, %v3911_v42 }
 0x1ac   :  { %2988 = vmax.xlane.f32.xlu1 %v2987_v13 }
 0x1ae   :  { %2997 = vmax.xlane.f32.xlu0 %v2996_v14 }
 0x1b0   :  { %2994 = vmax.xlane.f32.xlu1 %v2993_v57 }
 0x223   :  { %v1214_v25 = vpop.xlane.xlu0 %1213 }
 0x227   :  { %v1211_v26 = vpop.xlane.xlu0 %1210 }
 0x228   :  { %v1221_v27 = vadd.f32 %v1214_v25, %v1211_v26 }
 0x22a   :  { %v1222_v28 = vrot.slane %v1221_v27, 4 }
 0x22c   :  { %v1223_v29 = vadd.f32 %v1222_v28, %v1221_v27 }
 0x22e   :  { %v1224_v30 = vrot.slane %v1223_v29, 2 }
 0x22f   :  { %v1220_v31 = vpop.xlane.xlu0 %1219 }
 0x230   :  { %v1225_v32 = vadd.f32 %v1224_v30, %v1223_v29 }
 0x231   :  { %v1217_v34 = vpop.xlane.xlu1 %1216 }
 0x232   :  { %v1226_v38 = vrot.slane %v1225_v32, 1  ;;  %v1228_v39 = vadd.f32 %v1220_v31, %v1217_v34 }
 0x233   :  { %v2992_v40 = vpop.xlane.xlu0 %2991 }
 0x234   :  { %v1227_v35 = vadd.f32 %v1226_v38, %v1225_v32  ;;  %v1229_v43 = vrot.slane %v1228_v39, 4 }
 0x235   :  { %v2989_v44 = vpop.xlane.xlu1 %2988 }
 0x236   :  { %3708 = vrcp.f32 %v1227_v35  ;;  %v1230_v45 = vadd.f32 %v1229_v43, %v1228_v39  ;;  %v2999_v46 = vmax.f32 %v2989_v44, %v2992_v40 }
 0x237   :  { %v2998_v36 = vpop.xlane.xlu0 %2997 }
 0x238   :  { %v1231_v48 = vrot.slane %v1230_v45, 2  ;;  %v3000_v33 = vrot.slane %v2999_v46, 4 }
 0x239   :  { %v2995_v37 = vpop.xlane.xlu1 %2994 }
 0x23a   :  { %v1232_v49 = vadd.f32 %v1231_v48, %v1230_v45  ;;  %v3001_v50 = vmax.f32 %v2999_v46, %v3000_v33  ;;  %v3006_v51 = vmax.f32 %v2995_v37, %v2998_v36 }
 0x23c   :  { %v1233_v52 = vrot.slane %v1232_v49, 1  ;;  %v3002_v53 = vrot.slane %v3001_v50, 2  ;;  %v3007_v54 = vrot.slane %v3006_v51, 4 }
 0x23e   :  { %v1234_v55 = vadd.f32 %v1233_v52, %v1232_v49  ;;  %v3003_v58 = vmax.f32 %v3001_v50, %v3002_v53  ;;  %v3008_v59 = vmax.f32 %v3006_v51, %v3007_v54 }
 0x240   :  { %3710 = vrcp.f32 %v1234_v55  ;;  %v3004_v62 = vrot.slane %v3003_v58, 1  ;;  %v3009_v63 = vrot.slane %v3008_v59, 2 }
 0x242   :  { %v3005_v4 = vmax.f32 %v3003_v58, %v3004_v62  ;;  %v3010_v5 = vmax.f32 %v3008_v59, %v3009_v63 }
 0x243   :  { %v3709_v10 = vpop.eup %3708 }
 0x244   :  { %v3011_v13 = vrot.slane %v3010_v5, 1  ;;  %v4036_v14 = vmul.f32 %v3709_v10, %v3966_v41  ;;  %v4039_v57 = vmul.f32 %v3709_v10, %v3970_v47  ;;  %vm3014_vm2 = vcmp.eq.f32.partialorder %v3983_v7, %v3005_v4 }
 0x245   :  { %vm3013_vm3 = vcmp.eq.f32.partialorder %v3988_v11, %v3005_v4  ;;  %v3018_v20 = vsel %vm3014_vm2, %v4033_v61, 256 }
 0x246   :  { %v3012_v2 = vmax.f32 %v3010_v5, %v3011_v13  ;;  %v3118_v15 = vsel %vm1174_vm1, %v4036_v14, -inf  ;;  %v3115_v8 = vsel %vm1174_vm1, %v4039_v57, -inf  ;;  %v4052_v41 = vsub.f32 %v3988_v11, %v4039_v57 }
 0x247   :  { %3119 = vmax.xlane.f32.xlu0 %v3118_v15  ;;  %3116 = vmax.xlane.f32.xlu1 %v3115_v8  ;;  %v1294_v47 = vsub.f32 %v3983_v7, %v4036_v14  ;;  %v3017_v25 = vsel %vm3013_vm3, %v4043_v3, 256  ;;  %v4066_v27 = vsel %vm1174_vm1, %v3018_v20, 2147483647 }
 0x248   :  { %v1300_v22 = vsel %vm1174_vm1, %v4052_v41, 0  ;;  %vm3016_vm4 = vcmp.eq.f32.partialorder %v3993_v12, %v3012_v2  ;;  %vm3015_vm5 = vcmp.eq.f32.partialorder %v3998_v56, %v3012_v2  ;;  %v4081_v31 = vsel %vm1174_vm1, %v3017_v25, 2147483647 }
 0x249   :  { %v4059_v23 = vand.u32 4294901760, %v1300_v22  ;;  %v1303_v24 = vsel %vm1174_vm1, %v1294_v47, 0  ;;  %v4070_v28 = vand.u32 4294901760, %v1294_v47  ;;  %v3020_v32 = vsel %vm3016_vm4, %v4033_v61, 256 }
 0x24a   :  { %v4063_v26 = vand.u32 4294901760, %v1303_v24  ;;  %v3038_v39 = vshra.s32 %v4066_v27, 16  ;;  %v3019_v44 = vsel %vm3015_vm5, %v4043_v3, 256  ;;  %v3023_v46 = vshra.s32 %v4081_v31, 16 }
 0x24b   :  { %3544 = vmatprep.mubr.f32.mxu1 %v4059_v23  ;;  %v4073_v29 = vsub.f32 %v1300_v22, %v4059_v23  ;;  %v4100_v48 = vsel %vm1174_vm1, %v3020_v32, 2147483647  ;;  %v4120_v51 = vsel %vm1174_vm1, %v3019_v44, 2147483647  ;;  %v4123_v52 = vand.u32 4294901760, %v4052_v41 }
 0x24c   :  { %v4077_v30 = vsub.f32 %v1303_v24, %v4063_v26  ;;  %3545 = vmatmul.mubr.f32.vlgmr.msra.gmra.mxu1 %v4063_v26  ;;  %v4129_v58 = vcvt.s32.f32 %v3038_v39  ;;  %v3068_v60 = vshra.s32 %v4100_v48, 16  ;;  %v4134_v62 = vcvt.s32.f32 %v3023_v46 }
 0x24d   :  { %v3711_v34 = vpop.eup %3710  ;;  %v1380_v38 = vand.u32 4294901760, %v4073_v29  ;;  %3561 = vmatpush3.msra.mxu1 %v4004_v16  ;;  %v3053_v0 = vshra.s32 %v4120_v51, 16  ;;  %v4158_v20 = vsub.f32 %v4052_v41, %v4123_v52 }
 0x24e   :  { %v4088_v40 = vmul.f32 %v3711_v34, %v3976_v1  ;;  %v4091_v35 = vmul.f32 %v3711_v34, %v3980_v6  ;;  %v1390_v43 = vand.u32 4294901760, %v4077_v30  ;;  %3562 = vmatprep.subr.mxu1 %v4009_v18  ;;  %v4103_v1 = vsub.f32 %v1294_v47, %v4070_v28 }
 0x24f   :  { %v1381_v45 = vsub.f32 %v4073_v29, %v1380_v38  ;;  %3563 = vmatpush3.msra.mxu1 %v4009_v18  ;;  %v4148_v13 = vcvt.s32.f32 %v3068_v60  ;;  %v4151_v15 = vcvt.s32.f32 %v3053_v0 }
 0x250   :  { %v3124_v6 = vsel %vm1174_vm1, %v4088_v40, -inf  ;;  %v3121_v33 = vsel %vm1174_vm1, %v4091_v35, -inf  ;;  %v1391_v36 = vsub.f32 %v4077_v30, %v1390_v43  ;;  %v4112_v37 = vsub.f32 %v3998_v56, %v4091_v35  ;;  %3580 = vmatprep.subr.mxu1 %v4004_v16 }
 0x251   :  { %3125 = vmax.xlane.f32.xlu0 %v3124_v6  ;;  %3122 = vmax.xlane.f32.xlu1 %v3121_v33  ;;  %v1382_v49 = vand.u32 4294901760, %v1381_v45  ;;  %v4117_v50 = vsub.f32 %v3993_v12, %v4088_v40  ;;  %v4140_v4 = vand.u32 4294901760, %v4103_v1 }
 0x252   :  { %v1392_v53 = vand.u32 4294901760, %v1391_v36  ;;  %v1306_v54 = vsel %vm1174_vm1, %v4112_v37, 0  ;;  %v4204_v46 = vand.u32 4294901760, %v4112_v37 }
 0x253   :  { %3534 = vmatprep.mubr.f32.mxu0 %v1382_v49  ;;  %v4127_v55 = vand.u32 4294901760, %v1306_v54  ;;  %v1309_v59 = vsel %vm1174_vm1, %v4117_v50, 0  ;;  %v2058_v8 = vsub.f32 %v4103_v1, %v4140_v4  ;;  %v4193_v45 = vand.u32 4294901760, %v4117_v50  ;;  %v1931_v49 = vld [vmem:[%s4468_s5 + $0x10] sm:$0xff] }
 0x254   :  { %3535 = vmatmul.mubr.f32.vlgmr.msra.gmra.mxu0 %v1392_v53  ;;  %v4136_v63 = vand.u32 4294901760, %v1309_v59  ;;  %v4219_v36 = vsub.f32 %v4112_v37, %v4204_v46  ;;  %v1932_v37 = vld [vmem:[%s4468_s5 + $0x18] sm:$0xff] }
 0x255   :  { %3547 = vmatprep.mubr.f32.mxu1 %v4127_v55  ;;  %3041 = vmin.xlane.f32.xlu0 %v4129_v58  ;;  %v1399_v5 = vsub.f32 %v1306_v54, %v4127_v55  ;;  %v2059_v41 = vand.u32 4294901760, %v2058_v8  ;;  %v2442_v54 = vsel %vm1174_vm1, %v1931_v49, 0 }
 0x256   :  { %3026 = vmin.xlane.f32.xlu1 %v4134_v62  ;;  %3548 = vmatmul.mubr.f32.gmra.mxu1 %v4136_v63  ;;  %v1409_v10 = vsub.f32 %v1309_v59, %v4136_v63  ;;  %v4240_v53 = vand.u32 4294901760, %v4219_v36  ;;  %v2445_v59 = vsel %vm1174_vm1, %v1932_v37, 0  ;;  %v2514_v0 = vand.u32 4294901760, %v2442_v54 }
 0x257   :  { %3564 = vmatprep.mubr.f32.mxu1 %v1380_v38  ;;  %v1400_v2 = vand.u32 4294901760, %v1399_v5  ;;  %3551 = vmatpush3.msra.mxu0 %v4007_v17  ;;  %v1929_v17 = vld [vmem:[%s4468_s5] sm:$0xff]  ;;  %v1930_v38 = vld [vmem:[%s4468_s5 + $0x8] sm:$0xff] }
 0x258   :  { %v1410_v47 = vand.u32 4294901760, %v1409_v10  ;;  %3552 = vmatprep.subr.mxu0 %v4017_v19  ;;  %v1934_v34 = vsel %vm1174_vm1, %v1929_v17, 0  ;;  %v1937_v39 = vsel %vm1174_vm1, %v1930_v38, 0 }
 0x259   :  { %3071 = vmin.xlane.f32.xlu0 %v4148_v13  ;;  %v1401_v22 = vsub.f32 %v1399_v5, %v1400_v2  ;;  %3553 = vmatpush3.msra.mxu0 %v4017_v19  ;;  %v4170_v19 = vand.u32 4294901760, %v4158_v20  ;;  %v4185_v44 = vand.u32 4294901760, %v1937_v39 }
 0x25a   :  { %3056 = vmin.xlane.f32.xlu1 %v4151_v15  ;;  %3565 = vmatmul.mubr.f32.vlgmr.msra.gmra.mxu1 %v1390_v43  ;;  %v1411_v24 = vsub.f32 %v1409_v10, %v1410_v47 }
 0x25b   :  { %3581 = vmatpush3.msra.mxu1 %v4004_v16  ;;  %3567 = vmatprep.mubr.f32.mxu1 %v1400_v2  ;;  %v1402_v25 = vand.u32 4294901760, %v1401_v22  ;;  %v4178_v16 = vand.u32 4294901760, %v1934_v34  ;;  %v2065_v43 = vsub.f32 %v4158_v20, %v4170_v19 }
 0x25c   :  { %3582 = vmatprep.subr.mxu1 %v4009_v18  ;;  %v1412_v32 = vand.u32 4294901760, %v1411_v24  ;;  %3570 = vmatprep.subr.mxu0 %v4014_v9 }
 0x25d   :  { %3583 = vmatpush3.msra.mxu1 %v4009_v18  ;;  %3537 = vmatprep.mubr.f32.mxu0 %v1402_v25  ;;  %v4190_v18 = vsub.f32 %v1934_v34, %v4178_v16 }
 0x25e   :  { %3597 = vmatprep.subr.mxu1 %v2059_v41  ;;  %3538 = vmatmul.mubr.f32.gmra.mxu0 %v1412_v32 }
 0x25f   :  { %3568 = vmatmul.mubr.f32.gmra.mxu1 %v1410_v47  ;;  %3554 = vmatprep.mubr.f32.mxu0 %v4073_v29  ;;  %v2066_v29 = vand.u32 4294901760, %v2065_v43 }
 0x260   :  { %3584 = vmatprep.mubr.f32.mxu1 %v4059_v23 }
 0x262   :  { %3555 = vmatmul.mubr.f32.vlgmr.msra.gmra.mxu0 %v4077_v30  ;;  %v2008_v30 = vand.u32 4294901760, %v4190_v18 }
 0x263   :  { %3571 = vmatpush3.msra.mxu0 %v4014_v9  ;;  %3585 = vmatmul.mubr.f32.vlgmr.msra.gmra.mxu1 %v4063_v26  ;;  %v4199_v9 = vsub.f32 %v1937_v39, %v4185_v44 }
 0x264   :  { %3598 = vmatpush3.msra.mxu1 %v2059_v41  ;;  %3557 = vmatprep.mubr.f32.mxu0 %v1399_v5  ;;  %v2009_v33 = vsub.f32 %v4190_v18, %v2008_v30  ;;  %v2573_v5 = vsub.f32 %v4219_v36, %v4240_v53 }
 0x265   :  { %3572 = vmatprep.subr.mxu0 %v4024_v21  ;;  %3587 = vmatprep.mubr.f32.mxu1 %v4127_v55  ;;  %v2018_v6 = vand.u32 4294901760, %v4199_v9 }
 0x266   :  { %3599 = vmatprep.subr.mxu1 %v2066_v29  ;;  %3573 = vmatpush3.msra.mxu0 %v4024_v21  ;;  %v4211_v21 = vsub.f32 %v4117_v50, %v4193_v45  ;;  %v2010_v50 = vand.u32 4294901760, %v2009_v33 }
 0x267   :  { %3600 = vmatpush3.msra.mxu1 %v2066_v29  ;;  %3590 = vmatprep.subr.mxu0 %v4070_v28 }
 0x268   :  { %3611 = vmatprep.subr.mxu1 %v4070_v28  ;;  %3558 = vmatmul.mubr.f32.gmra.mxu0 %v1409_v10  ;;  %v2524_v10 = vand.u32 4294901760, %v2445_v59 }
 0x269   :  { %3588 = vmatmul.mubr.f32.gmra.mxu1 %v4136_v63  ;;  %3574 = vmatprep.mubr.f32.mxu0 %v4059_v23  ;;  %v4224_v23 = vand.u32 4294901760, %v4211_v21 }
 0x26a   :  { %3601 = vmatprep.mubr.f32.mxu1 %v4178_v16  ;;  %v2525_v8 = vsub.f32 %v2445_v59, %v2524_v10 }
 0x26c   :  { %3575 = vmatmul.mubr.f32.vlgmr.msra.gmra.mxu0 %v4063_v26  ;;  %v2019_v26 = vsub.f32 %v4199_v9, %v2018_v6 }
 0x26d   :  { %3591 = vmatpush3.msra.mxu0 %v4070_v28  ;;  %3602 = vmatmul.mubr.f32.vlgmr.msra.gmra.mxu1 %v4185_v44 }
 0x26e   :  { %3612 = vmatpush3.msra.mxu1 %v4070_v28  ;;  %3577 = vmatprep.mubr.f32.mxu0 %v4127_v55  ;;  %v2566_v55 = vsub.f32 %v4211_v21, %v4224_v23  ;;  %v2020_v60 = vand.u32 4294901760, %v2019_v26 }
 0x26f   :  { %3592 = vmatprep.subr.mxu0 %v4123_v52  ;;  %3613 = vmatprep.subr.mxu1 %v4123_v52 }
 0x270   :  { %3593 = vmatpush3.msra.mxu0 %v4123_v52  ;;  %3614 = vmatpush3.msra.mxu1 %v4123_v52  ;;  %v2567_v2 = vand.u32 4294901760, %v2566_v55 }
 0x271   :  { %3604 = vmatprep.subr.mxu0 %v4103_v1  ;;  %3615 = vmatprep.mubr.f32.mxu1 %v2008_v30 }
 0x272   :  { %3625 = vmatprep.subr.mxu1 %v4070_v28  ;;  %3578 = vmatmul.mubr.f32.gmra.mxu0 %v4136_v63  ;;  %v2515_v63 = vsub.f32 %v2442_v54, %v2514_v0 }
 0x273   :  { %3616 = vmatmul.mubr.f32.vlgmr.msra.gmra.mxu1 %v2018_v6  ;;  %3594 = vmatprep.mubr.f32.mxu0 %v2010_v50 }
 0x274   :  { %3626 = vmatpush3.msra.mxu1 %v4070_v28  ;;  %3629 = vmatprep.mubr.f32.mxu1 %v4178_v16  ;;  %v2574_v28 = vand.u32 4294901760, %v2573_v5 }
 0x275   :  { %3627 = vmatprep.subr.mxu1 %v4123_v52 }
 0x276   :  { %3628 = vmatpush3.msra.mxu1 %v4123_v52  ;;  %3595 = vmatmul.mubr.f32.vlgmr.msra.gmra.mxu0 %v2020_v60  ;;  %v2516_v52 = vand.u32 4294901760, %v2515_v63 }
 0x277   :  { %3639 = vmatprep.subr.mxu1 %v2567_v2  ;;  %3605 = vmatpush3.msra.mxu0 %v4103_v1  ;;  %v2526_v1 = vand.u32 4294901760, %v2525_v8 }
 0x278   :  { %3630 = vmatmul.mubr.f32.vlgmr.msra.gmra.mxu1 %v4185_v44  ;;  %3606 = vmatprep.subr.mxu0 %v4158_v20  ;;  %v2517_v47 = vsub.f32 %v2515_v63, %v2516_v52 }
 0x279   :  { %3640 = vmatpush3.msra.mxu1 %v2567_v2  ;;  %3607 = vmatpush3.msra.mxu0 %v4158_v20  ;;  %v2527_v20 = vsub.f32 %v2525_v8, %v2526_v1 }
 0x27a   :  { %3641 = vmatprep.subr.mxu1 %v2574_v28  ;;  %3608 = vmatprep.mubr.f32.mxu0 %v4190_v18 }
 0x27b   :  { %3642 = vmatpush3.msra.mxu1 %v2574_v28  ;;  %3618 = vmatprep.subr.mxu0 %v4140_v4  ;;  %v2528_v22 = vand.u32 4294901760, %v2527_v20 }
 0x27c   :  { %3643 = vmatprep.mubr.f32.mxu1 %v2514_v0  ;;  %3653 = vmatprep.subr.mxu1 %v4193_v45 }
 0x27d   :  { %3609 = vmatmul.mubr.f32.vlgmr.msra.gmra.mxu0 %v4199_v9  ;;  %3644 = vmatmul.mubr.f32.vlgmr.msra.gmra.mxu1 %v2524_v10 }
 0x27e   :  { %3619 = vmatpush3.msra.mxu0 %v4140_v4  ;;  %3654 = vmatpush3.msra.mxu1 %v4193_v45  ;;  %v2518_v4 = vand.u32 4294901760, %v2517_v47 }
 0x27f   :  { %3620 = vmatprep.subr.mxu0 %v4170_v19  ;;  %3655 = vmatprep.subr.mxu1 %v4204_v46 }
 0x280   :  { %3621 = vmatpush3.msra.mxu0 %v4170_v19  ;;  %3656 = vmatpush3.msra.mxu1 %v4204_v46 }
 0x281   :  { %3622 = vmatprep.mubr.f32.mxu0 %v4178_v16  ;;  %3632 = vmatprep.subr.mxu0 %v4193_v45 }
 0x282   :  { %3657 = vmatprep.mubr.f32.mxu1 %v2516_v52  ;;  %3667 = vmatprep.subr.mxu1 %v4193_v45  ;;  %v3052_v52 = vand.u32 65535, %v4120_v51 }
 0x283   :  { %3623 = vmatmul.mubr.f32.vlgmr.msra.gmra.mxu0 %v4185_v44  ;;  %3658 = vmatmul.mubr.f32.vlgmr.msra.gmra.mxu1 %v2526_v1 }
 0x284   :  { %3633 = vmatpush3.msra.mxu0 %v4193_v45  ;;  %3668 = vmatpush3.msra.mxu1 %v4193_v45 }
 0x285   :  { %3634 = vmatprep.subr.mxu0 %v4204_v46  ;;  %3669 = vmatprep.subr.mxu1 %v4204_v46 }
 0x286   :  { %3635 = vmatpush3.msra.mxu0 %v4204_v46  ;;  %3670 = vmatpush3.msra.mxu1 %v4204_v46 }
 0x287   :  { %3636 = vmatprep.mubr.f32.mxu0 %v2518_v4  ;;  %3646 = vmatprep.subr.mxu0 %v4211_v21 }
 0x288   :  { %3637 = vmatmul.mubr.f32.vlgmr.msra.gmra.mxu0 %v2528_v22  ;;  %3671 = vmatprep.mubr.f32.mxu1 %v2514_v0 }
 0x289   :  { %3647 = vmatpush3.msra.mxu0 %v4211_v21  ;;  %3650 = vmatprep.mubr.f32.mxu0 %v2515_v63 }
 0x28a   :  { %3648 = vmatprep.subr.mxu0 %v4219_v36  ;;  %3672 = vmatmul.mubr.f32.vlgmr.msra.gmra.mxu1 %v2524_v10 }
 0x28b   :  { %3649 = vmatpush3.msra.mxu0 %v4219_v36 }
 0x28c   :  { %3660 = vmatprep.subr.mxu0 %v4224_v23  ;;  %3651 = vmatmul.mubr.f32.vlgmr.msra.gmra.mxu0 %v2525_v8  ;;  %v3067_v8 = vand.u32 65535, %v4100_v48 }
 0x28d   :  { %3661 = vmatpush3.msra.mxu0 %v4224_v23  ;;  %3664 = vmatprep.mubr.f32.mxu0 %v2514_v0 }
 0x28e   :  { %3662 = vmatprep.subr.mxu0 %v4240_v53 }
 0x28f   :  { %3663 = vmatpush3.msra.mxu0 %v4240_v53 }
 0x290   :  { %3665 = vmatmul.mubr.f32.vlgmr.msra.gmra.mxu0 %v2524_v10  ;;  %v3037_v10 = vand.u32 65535, %v4066_v27 }
 0x292   :  { %v3039_v27 = vcvt.s32.f32 %v3037_v10 }
 0x2d0   :  { %v3120_v17 = vpop.xlane.xlu0 %3119  ;;  %v3117_v24 = vpop.xlane.xlu1 %3116 }
 0x2d1   :  { %v3127_v25 = vmax.f32 %v3117_v24, %v3120_v17 }
 0x2d3   :  { %v3128_v41 = vrot.slane %v3127_v25, 4 }
 0x2d5   :  { %v3129_v32 = vmax.f32 %v3127_v25, %v3128_v41 }
 0x2d7   :  { %v3130_v19 = vrot.slane %v3129_v32, 2 }
 0x2d9   :  { %v3131_v34 = vmax.f32 %v3129_v32, %v3130_v19 }
 0x2da   :  { %v3126_v38 = vpop.xlane.xlu0 %3125  ;;  %v3123_v16 = vpop.xlane.xlu1 %3122 }
 0x2db   :  { %v3132_v39 = vrot.slane %v3131_v34, 1  ;;  %v3134_v43 = vmax.f32 %v3123_v16, %v3126_v38 }
 0x2dd   :  { %v3133_v44 = vmax.f32 %v3131_v34, %v3132_v39  ;;  %v3135_v18 = vrot.slane %v3134_v43, 4 }
 0x2de   :  { %v4309_v54 = vpop.xlane.xlu0 %3041 }
 0x2df   :  { %v3136_v29 = vmax.f32 %v3134_v43, %v3135_v18  ;;  %vm3142_vm6 = vcmp.eq.f32.partialorder %v4036_v14, %v3133_v44  ;;  %vm3141_vm7 = vcmp.eq.f32.partialorder %v4039_v57, %v3133_v44  ;;  %v4311_v55 = vpop.xlane.xlu1 %3026  ;;  %vm3043_vm10 = vcmp.eq.f32.partialorder %v4129_v58, %v4309_v54 }
 0x2e0   :  { %v3146_v45 = vsel %vm3142_vm6, %v4033_v61, 256  ;;  %v3145_v9 = vsel %vm3141_vm7, %v4043_v3, 256  ;;  %vm3028_vm11 = vcmp.eq.f32.partialorder %v4134_v62, %v4311_v55  ;;  %v3044_v1 = vsel %vm3043_vm10, %v3039_v27, inf }
 0x2e1   :  { %v3137_v30 = vrot.slane %v3136_v29, 2  ;;  %v4292_v46 = vsel %vm1174_vm1, %v3146_v45, 2147483647  ;;  %v4295_v21 = vsel %vm1174_vm1, %v3145_v9, 2147483647  ;;  %v3069_v58 = vcvt.s32.f32 %v3067_v8 }
 0x2e2   :  { %v3166_v6 = vshra.s32 %v4292_v46, 16  ;;  %v3151_v33 = vshra.s32 %v4295_v21, 16  ;;  %v4333_v63 = vpop.xlane.xlu0 %3071  ;;  %v3054_v62 = vcvt.s32.f32 %v3052_v52  ;;  %v1246_v8 = vadd.f32 1e-08, %v3993_v12 }
 0x2e3   :  { %v3138_v36 = vmax.f32 %v3136_v29, %v3137_v30  ;;  %4476 = vst [vmem:[#allocation13_spill] sm:$0xff] %v4333_v63  ;;  %v4335_v28 = vpop.xlane.xlu1 %3056  ;;  %vm3073_vm12 = vcmp.eq.f32.partialorder %v4148_v13, %v4333_v63  ;;  %v1245_v52 = vadd.f32 1e-08, %v3998_v56 }
 0x2e4   :  { %v4299_v23 = vcvt.s32.f32 %v3166_v6  ;;  %v4301_v49 = vcvt.s32.f32 %v3151_v33  ;;  %4477 = vst [vmem:[#allocation14_spill] sm:$0xff] %v4335_v28  ;;  %vm3058_vm13 = vcmp.eq.f32.partialorder %v4151_v15, %v4335_v28  ;;  %v3074_v20 = vsel %vm3073_vm12, %v3069_v58, inf }
 0x2e5   :  { %v3139_v26 = vrot.slane %v3138_v36, 1  ;;  %v3059_v4 = vsel %vm3058_vm13, %v3054_v62, inf }
 0x2e6   :  { %3169 = vmin.xlane.f32.xlu0 %v4299_v23  ;;  %3154 = vmin.xlane.f32.xlu1 %v4301_v49 }
 0x2e7   :  { %v3140_v37 = vmax.f32 %v3138_v36, %v3139_v26 }
 0x2e9   :  { %vm3144_vm8 = vcmp.eq.f32.partialorder %v4088_v40, %v3140_v37  ;;  %vm3143_vm9 = vcmp.eq.f32.partialorder %v4091_v35, %v3140_v37 }
 0x2ea   :  { %v3148_v50 = vsel %vm3144_vm8, %v4033_v61, 256  ;;  %v3147_v53 = vsel %vm3143_vm9, %v4043_v3, 256  ;;  %v3022_v61 = vand.u32 65535, %v4081_v31 }
 0x2eb   :  { %v4314_v59 = vsel %vm1174_vm1, %v3148_v50, 2147483647  ;;  %v4317_v60 = vsel %vm1174_vm1, %v3147_v53, 2147483647 }
 0x2ec   :  { %v3196_v0 = vshra.s32 %v4314_v59, 16  ;;  %v3181_v5 = vshra.s32 %v4317_v60, 16  ;;  %v3024_v31 = vcvt.s32.f32 %v3022_v61  ;;  %v1243_v61 = vadd.f32 1e-08, %v3988_v11 }
 0x2ee   :  { %v4323_v2 = vcvt.s32.f32 %v3196_v0  ;;  %v4325_v3 = vcvt.s32.f32 %v3181_v5  ;;  %v3029_v47 = vsel %vm3028_vm11, %v3024_v31, inf  ;;  %v1244_v0 = vadd.f32 1e-08, %v3983_v7 }
 0x2f0   :  { %3199 = vmin.xlane.f32.xlu0 %v4323_v2  ;;  %3184 = vmin.xlane.f32.xlu1 %v4325_v3  ;;  %3712 = vrcp.f32 %v1244_v0  ;;  %v3165_v0 = vand.u32 65535, %v4292_v46 }
 0x2f1   :  { %3714 = vrcp.f32 %v1243_v61  ;;  %v3150_v61 = vand.u32 65535, %v4295_v21 }
 0x2f2   :  { %3716 = vrcp.f32 %v1246_v8 }
 0x2f3   :  { %3718 = vrcp.f32 %v1245_v52 }
 0x2f4   :  { %3045 = vmin.xlane.f32.xlu0 %v3044_v1  ;;  %3030 = vmin.xlane.f32.xlu1 %v3029_v47 }
 0x2f8   :  { %3075 = vmin.xlane.f32.xlu0 %v3074_v20  ;;  %3060 = vmin.xlane.f32.xlu1 %v3059_v4 }
 0x2fd   :  { %v3713_v56 = vpop.eup %3712 }
 0x2fe   :  { %v3715_v28 = vpop.eup %3714  ;;  %v1250_v8 = vmul.f32 %v3713_v56, %v4036_v14 }
 0x2ff   :  { %v1248_v52 = vmul.f32 %v3715_v28, %v4039_v57  ;;  %v3717_v28 = vpop.eup %3716 }
 0x300   :  { %3720 = vlog2.f32 %v1250_v8 }
 0x301   :  { %3722 = vlog2.f32 %v1248_v52 }
 0x30c   :  { %v3546_v48 = vpop.f32.mrf.mxu1 }
 0x30e   :  { %v1495_v24 = vpop.f32.mrf.mxu1 }
 0x314   :  { %v3536_v22 = vpop.f32.mrf.mxu0 }
 0x315   :  { %v1502_v11 = vadd.f32 %v3546_v48, %v3536_v22  ;;  %v3167_v22 = vcvt.s32.f32 %v3165_v0  ;;  %v3152_v48 = vcvt.s32.f32 %v3150_v61 }
 0x316   :  { %v1384_v17 = vpop.f32.mrf.mxu0  ;;  %v3549_v25 = vpop.f32.mrf.mxu1 }
 0x317   :  { %v1496_v62 = vadd.f32 %v1495_v24, %v1384_v17 }
 0x318   :  { %v1507_v32 = vpop.f32.mrf.mxu1 }
 0x31a   :  { %v3566_v34 = vpop.f32.mrf.mxu1 }
 0x31c   :  { %v1685_v38 = vpop.f32.mrf.mxu1 }
 0x31e   :  { %v3539_v51 = vpop.f32.mrf.mxu0 }
 0x31f   :  { %v4343_v15 = vpop.f32.mrf.mxu1  ;;  %v1514_v63 = vadd.f32 %v3549_v25, %v3539_v51 }
 0x320   :  { %v1404_v41 = vpop.f32.mrf.mxu0 }
 0x321   :  { %v4345_v43 = vpop.f32.mrf.mxu1 }
 0x322   :  { %v3556_v19 = vpop.f32.mrf.mxu0 }
 0x323   :  { %v4347_v18 = vpop.f32.mrf.mxu1  ;;  %v1597_v20 = vadd.f32 %v3556_v19, %v1502_v11 }
 0x324   :  { %v1589_v13 = vpop.f32.mrf.mxu0 }
 0x325   :  { %v4349_v45 = vpop.f32.mrf.mxu1  ;;  %v1590_v4 = vadd.f32 %v1589_v13, %v1496_v62 }
 0x328   :  { %v3559_v16 = vpop.f32.mrf.mxu0 }
 0x329   :  { %v4353_v30 = vpop.f32.mrf.mxu1  ;;  %v1611_v19 = vadd.f32 %v3559_v16, %v1514_v63 }
 0x32a   :  { %v1603_v39 = vpop.f32.mrf.mxu0 }
 0x32b   :  { %v4357_v36 = vpop.f32.mrf.mxu1 }
 0x32c   :  { %v3576_v44 = vpop.f32.mrf.mxu0 }
 0x32d   :  { %v3603_v37 = vpop.f32.mrf.mxu1 }
 0x32e   :  { %v1786_v29 = vpop.f32.mrf.mxu0 }
 0x32f   :  { %v2103_v50 = vpop.f32.mrf.mxu1 }
 0x332   :  { %v4351_v9 = vpop.f32.mrf.mxu0 }
 0x333   :  { %v4360_v10 = vpop.f32.mrf.mxu1 }
 0x334   :  { %v4355_v6 = vpop.f32.mrf.mxu0 }
 0x335   :  { %v4363_v27 = vpop.f32.mrf.mxu1 }
 0x336   :  { %v3596_v33 = vpop.f32.mrf.mxu0 }
 0x337   :  { %v2110_v11 = vadd.f32 %v3603_v37, %v3596_v33  ;;  %v3180_v37 = vand.u32 65535, %v4317_v60  ;;  %v3033_v60 = vcvt.f32.s32 %v4311_v55 }
 0x338   :  { %v2012_v26 = vpop.f32.mrf.mxu0  ;;  %v4371_v47 = vpop.f32.mrf.mxu1 }
 0x339   :  { %4479 = vst [vmem:[#allocation16_spill] sm:$0xff] %v4371_v47  ;;  %v1686_v47 = vadd.f32 %v1685_v38, %v1590_v4  ;;  %v2104_v62 = vadd.f32 %v2103_v50, %v2012_v26  ;;  %v3719_v38 = vpop.eup %3718 }
 0x33a   :  { %v4373_v7 = vpop.f32.mrf.mxu1 }
 0x33b   :  { %4480 = vst [vmem:[#allocation17_spill] sm:$0xff] %v4373_v7  ;;  %v1694_v7 = vadd.f32 %v3566_v34, %v1597_v20  ;;  %v1787_v25 = vadd.f32 %v1786_v29, %v1686_v47 }
 0x33d   :  { %v3610_v53 = vpop.f32.mrf.mxu0  ;;  %v3645_v42 = vpop.f32.mrf.mxu1  ;;  %v1793_v51 = vadd.f32 %v3576_v44, %v1694_v7  ;;  %v1254_v44 = vmul.f32 %v3717_v28, %v4088_v40 }
 0x33e   :  { %v2193_v29 = vadd.f32 %v3610_v53, %v2110_v11 }
 0x33f   :  { %v2185_v5 = vpop.f32.mrf.mxu0  ;;  %v2611_v17 = vpop.f32.mrf.mxu1  ;;  %v1884_v50 = vadd.f32 %v4347_v18, %v1793_v51  ;;  %3724 = vlog2.f32 %v1254_v44 }
 0x340   :  { %v2186_v33 = vadd.f32 %v2185_v5, %v2104_v62 }
 0x343   :  { %v4365_v31 = vpop.f32.mrf.mxu0 }
 0x345   :  { %v4369_v1 = vpop.f32.mrf.mxu0 }
 0x346   :  { %4478 = vst [vmem:[#allocation15_spill] sm:$0xff] %v4369_v1  ;;  %v1508_v1 = vadd.f32 %v1507_v32, %v1404_v41 }
 0x348   :  { %v3638_v58 = vpop.f32.mrf.mxu0  ;;  %v1604_v46 = vadd.f32 %v1603_v39, %v1508_v1  ;;  %v3659_v39 = vpop.f32.mrf.mxu1  ;;  %v1878_v1 = vadd.f32 %v4349_v45, %v1787_v25  ;;  %v3182_v45 = vcvt.s32.f32 %v3180_v37 }
 0x349   :  { %v2618_v34 = vadd.f32 %v3645_v42, %v3638_v58  ;;  %v3195_v42 = vand.u32 65535, %v4314_v59  ;;  %v3048_v59 = vcvt.f32.s32 %v4309_v54  ;;  %v3721_v25 = vpop.eup %3720 }
 0x34a   :  { %v2520_v12 = vpop.f32.mrf.mxu0  ;;  %v1702_v26 = vadd.f32 %v4345_v43, %v1604_v46  ;;  %v2775_v58 = vpop.f32.mrf.mxu1  ;;  %v2268_v43 = vadd.f32 %v4363_v27, %v2186_v33  ;;  %v1899_v61 = vand.u32 2147483647, %v1878_v1 }
 0x34b   :  { %v2612_v63 = vadd.f32 %v2611_v17, %v2520_v12  ;;  %v3197_v18 = vcvt.s32.f32 %v3195_v42  ;;  %v3049_v17 = vshll.u32 %v3048_v59, 16 }
 0x34c   :  { %v3652_v24 = vpop.f32.mrf.mxu0  ;;  %v1799_v5 = vadd.f32 %v4355_v6, %v1702_v26  ;;  %v1900_v6 = vand.u32 2147483647, %v1884_v50  ;;  %v3673_v55 = vpop.f32.mrf.mxu1 }
 0x34d   :  { %v2701_v47 = vadd.f32 %v3652_v24, %v2618_v34  ;;  %v4481_v8 = vld [vmem:[#allocation15_spill] sm:$0xff]  ;;  %v1903_v34 = vsel %vm1174_vm1, %v1899_v61, 0.0 }
 0x34e   :  { %v2693_v16 = vpop.f32.mrf.mxu0  ;;  %v2353_v52 = vadd.f32 %v4481_v8, %v2268_v43  ;;  %v2939_v51 = vpop.f32.mrf.mxu1 }
 0x34f   :  { %v2694_v7 = vadd.f32 %v2693_v16, %v2612_v63 }
 0x350   :  { %v3666_v20 = vpop.f32.mrf.mxu0 }
 0x351   :  { %v2776_v12 = vadd.f32 %v2775_v58, %v2694_v7 }
 0x352   :  { %v2860_v54 = vpop.f32.mrf.mxu0 }
 0x353   :  { %v2861_v46 = vadd.f32 %v2860_v54, %v2776_v12 }
 0x36f   :  { %v4379_v13 = vpop.xlane.xlu0 %3169  ;;  %v4381_v21 = vpop.xlane.xlu1 %3154 }
 0x370   :  { %vm3171_vm14 = vcmp.eq.f32.partialorder %v4299_v23, %v4379_v13  ;;  %vm3156_vm15 = vcmp.eq.f32.partialorder %v4301_v49, %v4381_v21  ;;  %v1252_v23 = vmul.f32 %v3719_v38, %v4091_v35  ;;  %v1710_v49 = vadd.f32 %v4343_v15, %v1611_v19  ;;  %v3723_v38 = vpop.eup %3722 }
 0x371   :  { %v3172_v41 = vsel %vm3171_vm14, %v3167_v22, inf  ;;  %v3157_v32 = vsel %vm3156_vm15, %v3152_v48, inf  ;;  %v2276_v15 = vadd.f32 %v4360_v10, %v2193_v29  ;;  %v1890_v10 = vadd.f32 %v4357_v36, %v1799_v5 }
 0x372   :  { %3173 = vmin.xlane.f32.xlu0 %v3172_v41  ;;  %3158 = vmin.xlane.f32.xlu1 %v3157_v32  ;;  %v1805_v53 = vadd.f32 %v4351_v9, %v1710_v49  ;;  %3726 = vlog2.f32 %v1252_v23  ;;  %v2784_v9 = vadd.f32 %v3659_v39, %v2701_v47  ;;  %v4483_v41 = vld [vmem:[#allocation17_spill] sm:$0xff]  ;;  %v2940_v29 = vadd.f32 %v2939_v51, %v2861_v46  ;;  %v3725_v23 = vpop.eup %3724 }
 0x373   :  { %v2359_v27 = vadd.f32 %v4365_v31, %v2276_v15  ;;  %v4482_v31 = vld [vmem:[#allocation16_spill] sm:$0xff]  ;;  %v2432_v32 = vadd.f32 %v4483_v41, %v2353_v52  ;;  %v1901_v63 = vand.u32 2147483647, %v1890_v10  ;;  %v1258_v5 = vmul.f32 0.6931472, %v3721_v25  ;;  %v4484_v10 = vld [vmem:[#allocation13_spill] sm:$0xff] }
 0x374   :  { %v1896_v56 = vadd.f32 %v4353_v30, %v1805_v53  ;;  %v3034_v30 = vshll.u32 %v3033_v60, 16  ;;  %v2867_v19 = vadd.f32 %v3666_v20, %v2784_v9  ;;  %v2951_v47 = vand.u32 2147483647, %v2940_v29 }
 0x375   :  { %v2438_v28 = vadd.f32 %v4482_v31, %v2359_v27  ;;  %v2949_v26 = vand.u32 2147483647, %v2432_v32  ;;  %v1909_v37 = vsel %vm1174_vm1, %v1901_v63, 0.0  ;;  %v1256_v58 = vmul.f32 0.6931472, %v3723_v38 }
 0x376   :  { %v1902_v62 = vand.u32 2147483647, %v1896_v56  ;;  %v2946_v44 = vadd.f32 %v3673_v55, %v2867_v19  ;;  %v2959_v15 = vsel %vm1174_vm1, %v2951_v47, 0.0  ;;  %v1264_v43 = vmul.f32 %v1258_v5, %v4036_v14  ;;  %v4485_v55 = vld [vmem:[#allocation14_spill] sm:$0xff] }
 0x377   :  { %v2950_v49 = vand.u32 2147483647, %v2438_v28  ;;  %v2953_v53 = vsel %vm1174_vm1, %v2949_v26, 0.0  ;;  %v1263_v59 = vmul.f32 %v1256_v58, %v4039_v57  ;;  %v1262_v60 = vmul.f32 0.6931472, %v3725_v23 }
 0x378   :  { %v1912_v33 = vsel %vm1174_vm1, %v1902_v62, 0.0  ;;  %v2952_v1 = vand.u32 2147483647, %v2946_v44  ;;  %v3078_v54 = vcvt.f32.s32 %v4484_v10  ;;  %v3063_v27 = vcvt.f32.s32 %v4485_v55 }
 0x379   :  { %v4401_v4 = vpop.xlane.xlu0 %3199  ;;  %v4403_v0 = vpop.xlane.xlu1 %3184  ;;  %v2956_v7 = vsel %vm1174_vm1, %v2950_v49, 0.0  ;;  %v1267_v9 = vsel %vm1174_vm1, %v1263_v59, 0.0  ;;  %v3176_v46 = vcvt.f32.s32 %v4379_v13 }
 0x37a   :  { %vm3201_vm0 = vcmp.eq.f32.partialorder %v4323_v2, %v4401_v4  ;;  %vm3186_vm2 = vcmp.eq.f32.partialorder %v4325_v3, %v4403_v0  ;;  %v1906_v3 = vsel %vm1174_vm1, %v1900_v6, 0.0  ;;  %v2962_v20 = vsel %vm1174_vm1, %v2952_v1, 0.0 }
 0x37b   :  { %v3202_v22 = vsel %vm3201_vm0, %v3197_v18, inf  ;;  %v3187_v48 = vsel %vm3186_vm2, %v3182_v45, inf  ;;  %v1270_v45 = vsel %vm1174_vm1, %v1264_v43, 0.0  ;;  %v1266_v6 = vmul.f32 %v1262_v60, %v4088_v40 }
 0x37c   :  { %3203 = vmin.xlane.f32.xlu0 %v3202_v22  ;;  %3188 = vmin.xlane.f32.xlu1 %v3187_v48  ;;  %v3079_v22 = vshll.u32 %v3078_v54, 16  ;;  %v3064_v40 = vshll.u32 %v3063_v27, 16  ;;  %v3191_v13 = vcvt.f32.s32 %v4403_v0 }
 0x37d   :  { %v3046_v24 = vpop.xlane.xlu0 %3045  ;;  %v3031_v36 = vpop.xlane.xlu1 %3030  ;;  %v1276_v12 = vsel %vm1174_vm1, %v1266_v6, 0.0 }
 0x37e   :  { %v3047_v2 = vcvt.f32.s32 %v3046_v24  ;;  %v3032_v11 = vcvt.f32.s32 %v3031_v36 }
 0x37f   :  { %v3727_v50 = vpop.eup %3726 }
 0x380   :  { %v3050_v16 = vadd.s32 %v3049_v17, %v3047_v2  ;;  %v3035_v39 = vadd.s32 %v3034_v30, %v3032_v11  ;;  %1907 = vadd.xlane.f32.xlu0 %v1906_v3  ;;  %1904 = vadd.xlane.f32.xlu1 %v1903_v34  ;;  %v1260_v18 = vmul.f32 0.6931472, %v3727_v50  ;;  %v3161_v2 = vcvt.f32.s32 %v4381_v21 }
 0x381   :  { %v3076_v57 = vpop.xlane.xlu0 %3075  ;;  %v3061_v56 = vpop.xlane.xlu1 %3060  ;;  %v3177_v3 = vshll.u32 %v3176_v46, 16 }
 0x382   :  { %vm3081_vm3 = vcmp.lt.s32.totalorder %v3035_v39, %v3050_v16  ;;  %v1265_v61 = vmul.f32 %v1260_v18, %v4091_v35  ;;  %v3077_v8 = vcvt.f32.s32 %v3076_v57  ;;  %v3062_v52 = vcvt.f32.s32 %v3061_v56 }
 0x383   :  { %v3082_v42 = vsel %vm3081_vm3, %v3035_v39, %v3050_v16  ;;  %v3162_v31 = vshll.u32 %v3161_v2, 16  ;;  %v3206_v16 = vcvt.f32.s32 %v4401_v4  ;;  %vm3275_vm3 = vcmask 0  }
 0x384   :  { %1913 = vadd.xlane.f32.xlu0 %v1912_v33  ;;  %1910 = vadd.xlane.f32.xlu1 %v1909_v37  ;;  %v1273_v14 = vsel %vm1174_vm1, %v1265_v61, 0.0  ;;  %v3080_v48 = vadd.s32 %v3079_v22, %v3077_v8  ;;  %v3065_v35 = vadd.s32 %v3064_v40, %v3062_v52  ;;  %v3083_v17 = vrot.slane %v3082_v42, 4 }
 0x385   :  { %v3207_v29 = vshll.u32 %v3206_v16, 16  ;;  %v3192_v33 = vshll.u32 %v3191_v13, 16 }
 0x386   :  { %vm3092_vm4 = vcmp.lt.s32.totalorder %v3065_v35, %v3080_v48  ;;  %vm3084_vm5 = vcmp.lt.s32.totalorder %v3082_v42, %v3083_v17 }
 0x387   :  { %v3093_v30 = vsel %vm3092_vm4, %v3065_v35, %v3080_v48  ;;  %v3085_v24 = vsel %vm3084_vm5, %v3082_v42, %v3083_v17 }
 0x388   :  { %2957 = vadd.xlane.f32.xlu0 %v2956_v7  ;;  %2954 = vadd.xlane.f32.xlu1 %v2953_v53  ;;  %v3094_v36 = vrot.slane %v3093_v30, 4  ;;  %v3086_v19 = vrot.slane %v3085_v24, 2 }
 0x38a   :  { %vm3095_vm1 = vcmp.lt.s32.totalorder %v3093_v30, %v3094_v36  ;;  %vm3087_vm6 = vcmp.lt.s32.totalorder %v3085_v24, %v3086_v19 }
 0x38b   :  { %v3096_v11 = vsel %vm3095_vm1, %v3093_v30, %v3094_v36  ;;  %v3088_v62 = vsel %vm3087_vm6, %v3085_v24, %v3086_v19 }
 0x38c   :  { %2963 = vadd.xlane.f32.xlu0 %v2962_v20  ;;  %2960 = vadd.xlane.f32.xlu1 %v2959_v15  ;;  %v3097_v28 = vrot.slane %v3096_v11, 2  ;;  %v3089_v34 = vrot.slane %v3088_v62, 1 }
 0x38e   :  { %vm3098_vm7 = vcmp.lt.s32.totalorder %v3096_v11, %v3097_v28  ;;  %vm3090_vm9 = vcmp.lt.s32.totalorder %v3088_v62, %v3089_v34 }
 0x38f   :  { %v3099_v44 = vsel %vm3098_vm7, %v3096_v11, %v3097_v28  ;;  %v3091_v23 = vsel %vm3090_vm9, %v3088_v62, %v3089_v34 }
 0x390   :  { %1271 = vadd.xlane.f32.xlu0 %v1270_v45  ;;  %1268 = vadd.xlane.f32.xlu1 %v1267_v9  ;;  %v3100_v37 = vrot.slane %v3099_v44, 1  ;;  %v3105_v7 = vand.u32 15, %v3091_v23  ;;  %v3103_v0 = vshra.s32 %v3091_v23, 4 }
 0x392   :  { %vm3101_vm12 = vcmp.lt.s32.totalorder %v3099_v44, %v3100_v37  ;;  %v3107_v60 = vcvt.s32.f32 %v3105_v7  ;;  %v3111_v9 = vcvt.s32.f32 %v3103_v0 }
 0x393   :  { %v3102_v6 = vsel %vm3101_vm12, %v3099_v44, %v3100_v37 }
 0x394   :  { %1277 = vadd.xlane.f32.xlu0 %v1276_v12  ;;  %1274 = vadd.xlane.f32.xlu1 %v1273_v14  ;;  %v3109_v27 = vmul.f32 0.06666667, %v3107_v60  ;;  %v3113_v40 = vmul.f32 0.06666667, %v3111_v9  ;;  %v3104_v48 = vshra.s32 %v3102_v6, 4  ;;  %v3106_v35 = vand.u32 15, %v3102_v6 }
 0x396   :  { %v3112_v28 = vcvt.s32.f32 %v3104_v48 }
 0x3fb   :  { %v3174_v51 = vpop.xlane.xlu0 %3173  ;;  %v3159_v25 = vpop.xlane.xlu1 %3158 }
 0x3fc   :  { %v3175_v41 = vcvt.f32.s32 %v3174_v51  ;;  %v3160_v32 = vcvt.f32.s32 %v3159_v25 }
 0x3fe   :  { %v3178_v63 = vadd.s32 %v3177_v3, %v3175_v41  ;;  %v3163_v38 = vadd.s32 %v3162_v31, %v3160_v32  ;;  %v3108_v31 = vcvt.s32.f32 %v3106_v35 }
 0x400   :  { %vm3209_vm8 = vcmp.lt.s32.totalorder %v3163_v38, %v3178_v63 }
 0x401   :  { %v3210_v21 = vsel %vm3209_vm8, %v3163_v38, %v3178_v63 }
 0x402   :  { %v3211_v39 = vrot.slane %v3210_v21, 4 }
 0x404   :  { %vm3212_vm10 = vcmp.lt.s32.totalorder %v3210_v21, %v3211_v39 }
 0x405   :  { %v3213_v49 = vsel %vm3212_vm10, %v3210_v21, %v3211_v39  ;;  %v3204_v26 = vpop.xlane.xlu0 %3203  ;;  %v3189_v42 = vpop.xlane.xlu1 %3188 }
 0x406   :  { %v3214_v50 = vrot.slane %v3213_v49, 2  ;;  %v3205_v1 = vcvt.f32.s32 %v3204_v26  ;;  %v3190_v47 = vcvt.f32.s32 %v3189_v42  ;;  %v3114_v26 = vmul.f32 0.06666667, %v3112_v28 }
 0x408   :  { %vm3215_vm11 = vcmp.lt.s32.totalorder %v3213_v49, %v3214_v50  ;;  %v3208_v4 = vadd.s32 %v3207_v29, %v3205_v1  ;;  %v3193_v53 = vadd.s32 %v3192_v33, %v3190_v47 }
 0x409   :  { %v3216_v5 = vsel %vm3215_vm11, %v3213_v49, %v3214_v50  ;;  %v1908_v58 = vpop.xlane.xlu0 %1907  ;;  %v1905_v20 = vpop.xlane.xlu1 %1904  ;;  %v3110_v49 = vmul.f32 0.06666667, %v3108_v31 }
 0x40a   :  { %v3217_v15 = vrot.slane %v3216_v5, 1  ;;  %vm3220_vm13 = vcmp.lt.s32.totalorder %v3193_v53, %v3208_v4  ;;  %v1915_v43 = vadd.f32 %v1908_v58, %v1905_v20 }
 0x40b   :  { %v3221_v59 = vsel %vm3220_vm13, %v3193_v53, %v3208_v4 }
 0x40c   :  { %vm3218_vm14 = vcmp.lt.s32.totalorder %v3216_v5, %v3217_v15  ;;  %v3222_v18 = vrot.slane %v3221_v59, 4  ;;  %v1916_v45 = vrot.slane %v1915_v43, 4 }
 0x40d   :  { %v3219_v61 = vsel %vm3218_vm14, %v3216_v5, %v3217_v15  ;;  %v1914_v12 = vpop.xlane.xlu0 %1913  ;;  %v1911_v14 = vpop.xlane.xlu1 %1910 }
 0x40e   :  { %v3231_v57 = vshra.s32 %v3219_v61, 4  ;;  %v3233_v56 = vand.u32 15, %v3219_v61  ;;  %vm3223_vm15 = vcmp.lt.s32.totalorder %v3221_v59, %v3222_v18  ;;  %v1917_v10 = vadd.f32 %v1916_v45, %v1915_v43 }
 0x40f   :  { %v3224_v54 = vsel %vm3223_vm15, %v3221_v59, %v3222_v18  ;;  %v1922_v55 = vadd.f32 %v1914_v12, %v1911_v14 }
 0x410   :  { %v3235_v8 = vcvt.s32.f32 %v3233_v56  ;;  %v3239_v52 = vcvt.s32.f32 %v3231_v57  ;;  %v3225_v22 = vrot.slane %v3224_v54, 2  ;;  %v1918_v46 = vrot.slane %v1917_v10, 2 }
 0x411   :  { %v1923_v17 = vrot.slane %v1922_v55, 4  ;;  %v2958_v30 = vpop.xlane.xlu0 %2957  ;;  %v2955_v24 = vpop.xlane.xlu1 %2954 }
 0x412   :  { %v3237_v36 = vmul.f32 0.06666667, %v3235_v8  ;;  %v3241_v19 = vmul.f32 0.06666667, %v3239_v52  ;;  %vm3226_vm0 = vcmp.lt.s32.totalorder %v3224_v54, %v3225_v22  ;;  %v2965_v3 = vadd.f32 %v2958_v30, %v2955_v24 }
 0x413   :  { %v3227_v2 = vsel %vm3226_vm0, %v3224_v54, %v3225_v22  ;;  %v1924_v11 = vadd.f32 %v1923_v17, %v1922_v55  ;;  %v1919_v16 = vadd.f32 %v1918_v46, %v1917_v10  ;;  %v70_v46 = vld [vmem:[%s4464_s1] sm:$0x1] }
 0x414   :  { %v3243_v62 = vsub.f32 %v3109_v27, %v3237_v36  ;;  %v3247_v51 = vsub.f32 %v3113_v40, %v3241_v19  ;;  %v3228_v25 = vrot.slane %v3227_v2, 1  ;;  %v2966_v41 = vrot.slane %v2965_v3, 4 }
 0x415   :  { %v2964_v32 = vpop.xlane.xlu0 %2963  ;;  %v2961_v34 = vpop.xlane.xlu1 %2960  ;;  %v1925_v21 = vrot.slane %v1924_v11, 2  ;;  %v1920_v53 = vrot.slane %v1919_v16, 1 }
 0x416   :  { %v3245_v63 = vmul.f32 %v3243_v62, %v3243_v62  ;;  %v3249_v38 = vmul.f32 %v3247_v51, %v3247_v51  ;;  %vm3229_vm2 = vcmp.lt.s32.totalorder %v3227_v2, %v3228_v25  ;;  %v2967_v39 = vadd.f32 %v2966_v41, %v2965_v3  ;;  %v71_v3 = vld [vmem:[%s4464_s1 + $0x1] sm:$0x1] }
 0x417   :  { %v3230_v13 = vsel %vm3229_vm2, %v3227_v2, %v3228_v25  ;;  %v2972_v44 = vadd.f32 %v2964_v32, %v2961_v34  ;;  %v1926_v0 = vadd.f32 %v1925_v21, %v1924_v11  ;;  %v1921_v14 = vadd.f32 %v1920_v53, %v1919_v16 }
 0x418   :  { %v4437_v29 = vadd.f32 %v3249_v38, %v3245_v63  ;;  %v3232_v33 = vshra.s32 %v3230_v13, 4  ;;  %v3234_v23 = vand.u32 15, %v3230_v13  ;;  %v2968_v42 = vrot.slane %v2967_v39, 2 }
 0x419   :  { %v2973_v37 = vrot.slane %v2972_v44, 4  ;;  %v1272_v50 = vpop.xlane.xlu0 %1271  ;;  %v1269_v1 = vpop.xlane.xlu1 %1268  ;;  %v1927_v57 = vrot.slane %v1926_v0, 1 }
 0x41a   :  { %v3236_v47 = vcvt.s32.f32 %v3234_v23  ;;  %v3240_v7 = vcvt.s32.f32 %v3232_v33  ;;  %v1279_v4 = vadd.f32 %v1272_v50, %v1269_v1  ;;  %3728 = vrsqrt.f32 %v4437_v29 }
 0x41b   :  { %v2969_v5 = vadd.f32 %v2968_v42, %v2967_v39  ;;  %v2974_v58 = vadd.f32 %v2973_v37, %v2972_v44  ;;  %v1928_v17 = vadd.f32 %v1927_v57, %v1926_v0  ;;  %vm3255_vm4 = vcmp.eq.f32.partialorder %v4437_v29, inf }
 0x41c   :  { %v3238_v20 = vmul.f32 0.06666667, %v3236_v47  ;;  %v3242_v15 = vmul.f32 0.06666667, %v3240_v7  ;;  %v1280_v43 = vrot.slane %v1279_v4, 4  ;;  %v3258_v21 = vand.u32 2147483648, %v4437_v29 }
 0x41d   :  { %v2970_v59 = vrot.slane %v2969_v5, 1  ;;  %v2975_v60 = vrot.slane %v2974_v58, 2  ;;  %v1278_v18 = vpop.xlane.xlu0 %1277  ;;  %v1275_v45 = vpop.xlane.xlu1 %1274  ;;  %vm3257_vm5 = vcmp.eq.f32.partialorder %v4437_v29, 0.0  ;;  %v3826_v1 = vmov 0.0  }
 0x41e   :  { %v3244_v9 = vsub.f32 %v3110_v49, %v3238_v20  ;;  %v3248_v6 = vsub.f32 %v3114_v26, %v3242_v15  ;;  %v1281_v61 = vadd.f32 %v1280_v43, %v1279_v4  ;;  %v1286_v12 = vadd.f32 %v1278_v18, %v1275_v45 }
 0x41f   :  { %v2971_v56 = vadd.f32 %v2970_v59, %v2969_v5  ;;  %v2976_v10 = vadd.f32 %v2975_v60, %v2974_v58 }
 0x420   :  { %v3246_v54 = vmul.f32 %v3244_v9, %v3244_v9  ;;  %v3250_v55 = vmul.f32 %v3248_v6, %v3248_v6  ;;  %v1282_v27 = vrot.slane %v1281_v61, 2  ;;  %v1287_v8 = vrot.slane %v1286_v12, 4 }
 0x421   :  { %v2977_v52 = vrot.slane %v2976_v10, 1  ;;  %v2979_v22 = vadd.f32 %v2971_v56, %v1921_v14 }
 0x422   :  { %v3252_v40 = vadd.f32 %v3250_v55, %v3246_v54  ;;  %v1283_v48 = vadd.f32 %v1282_v27, %v1281_v61  ;;  %v1288_v35 = vadd.f32 %v1287_v8, %v1286_v12 }
 0x423   :  { %v2978_v30 = vadd.f32 %v2977_v52, %v2976_v10  ;;  %v2981_v24 = vmul.f32 0.5, %v2979_v22 }
 0x424   :  { %v1284_v36 = vrot.slane %v1283_v48, 1  ;;  %v1289_v19 = vrot.slane %v1288_v35, 2  ;;  %3730 = vrsqrt.f32 %v3252_v40  ;;  %vm3262_vm6 = vcmp.eq.f32.partialorder %v3252_v40, inf }
 0x425   :  { %v2980_v2 = vadd.f32 %v2978_v30, %v1928_v17  ;;  %v3288_v31 = vmul.f32 %v2981_v24, %v70_v46  ;;  %v3265_v50 = vand.u32 2147483648, %v3252_v40  ;;  %vm3264_vm7 = vcmp.eq.f32.partialorder %v3252_v40, 0.0 }
 0x426   :  { %v1290_v11 = vadd.f32 %v1289_v19, %v1288_v35  ;;  %v1285_v62 = vadd.f32 %v1284_v36, %v1283_v48  ;;  %v4486_v48 = vld [vmem:[#allocation12_spill] sm:$0xff] }
 0x427   :  { %v3729_v51 = vpop.eup %3728  ;;  %v2982_v25 = vmul.f32 0.5, %v2980_v2  ;;  %v3290_v16 = vsel %vm3275_vm3, %v3288_v31, 0.0  ;;  %vm3316_vm9 = vcmp.eq.s32.totalorder %v4486_v48, 0  ;;  %vm3319_vm10 = vcmp.eq.s32.totalorder %v4486_v48, 1 }
 0x428   :  { %v1291_v28 = vrot.slane %v1290_v11, 1  ;;  %v3254_v41 = vmul.f32 %v3729_v51, %v4437_v29  ;;  %v3273_v63 = vmul.f32 %v1285_v62, %v70_v46  ;;  %vm3323_vm11 = vcmp.eq.s32.totalorder %v4486_v48, 2 }
 0x429   :  { %v3289_v32 = vmul.f32 %v2982_v25, %v71_v3 }
 0x42a   :  { %v1292_v34 = vadd.f32 %v1291_v28, %v1290_v11  ;;  %v3256_v38 = vsel %vm3255_vm4, %v4437_v29, %v3254_v41  ;;  %v3276_v23 = vsel %vm3275_vm3, %v3273_v63, 0.0 }
 0x42b   :  { %v3291_v13 = vsel %vm3275_vm3, %v3289_v32, 0.0  ;;  %v3259_v33 = vsel %vm3257_vm5, %v3258_v21, %v3256_v38 }
 0x42c   :  { %v3292_v39 = vadd.f32 %v3291_v13, %v3290_v16  ;;  %v3274_v44 = vmul.f32 %v1292_v34, %v71_v3  ;;  %vm3267_vm1 = vcmp.lt.f32.partialorder %v3259_v33, 0.1 }
 0x42d   :  { %v3348_v47 = vsel %vm3267_vm1, 1.0, %v3826_v1 }
 0x42e   :  { %3293 = vadd.xlane.f32.xlu0 %v3292_v39  ;;  %v3277_v49 = vsel %vm3275_vm3, %v3274_v44, 0.0  ;;  %v3302_v29 = vmul.f32 %v3348_v47, %v70_v46 }
 0x42f   :  { %v3278_v26 = vadd.f32 %v3277_v49, %v3276_v23 }
 0x430   :  { %v3304_v5 = vsel %vm3275_vm3, %v3302_v29, 0.0 }
 0x431   :  { %v3731_v42 = vpop.eup %3730  ;;  %3279 = vadd.xlane.f32.xlu1 %v3278_v26 }
 0x432   :  { %v3261_v37 = vmul.f32 %v3731_v42, %v3252_v40 }
 0x434   :  { %v3263_v7 = vsel %vm3262_vm6, %v3252_v40, %v3261_v37 }
 0x435   :  { %v3266_v4 = vsel %vm3264_vm7, %v3265_v50, %v3263_v7 }
 0x436   :  { %vm3268_vm8 = vcmp.lt.f32.partialorder %v3266_v4, 0.1 }
 0x437   :  { %v3349_v53 = vsel %vm3268_vm8, 1.0, %v3826_v1 }
 0x438   :  { %v3303_v0 = vmul.f32 %v3349_v53, %v71_v3 }
 0x43a   :  { %v3305_v58 = vsel %vm3275_vm3, %v3303_v0, 0.0 }
 0x43b   :  { %v3306_v20 = vadd.f32 %v3305_v58, %v3304_v5 }
 0x43d   :  { %3307 = vadd.xlane.f32.xlu1 %v3306_v20 }
 0x4b7   :  { %v3294_v15 = vpop.xlane.xlu0 %3293 }
 0x4b8   :  { %v3295_v43 = vrot.slane %v3294_v15, 4 }
 0x4ba   :  { %v3296_v59 = vadd.f32 %v3295_v43, %v3294_v15  ;;  %v3280_v60 = vpop.xlane.xlu1 %3279 }
 0x4bb   :  { %v3281_v18 = vrot.slane %v3280_v60, 4 }
 0x4bc   :  { %v3297_v45 = vrot.slane %v3296_v59, 2 }
 0x4bd   :  { %v3282_v9 = vadd.f32 %v3281_v18, %v3280_v60 }
 0x4be   :  { %v3298_v6 = vadd.f32 %v3297_v45, %v3296_v59 }
 0x4bf   :  { %v3283_v61 = vrot.slane %v3282_v9, 2 }
 0x4c0   :  { %v3299_v14 = vrot.slane %v3298_v6, 1 }
 0x4c1   :  { %v3284_v12 = vadd.f32 %v3283_v61, %v3282_v9 }
 0x4c2   :  { %v3300_v54 = vadd.f32 %v3299_v14, %v3298_v6 }
 0x4c3   :  { %v3285_v57 = vrot.slane %v3284_v12, 1 }
 0x4c5   :  { %v3286_v56 = vadd.f32 %v3285_v57, %v3284_v12 }
 0x4c6   :  { %v3308_v10 = vpop.xlane.xlu1 %3307 }
 0x4c7   :  { %v3309_v55 = vrot.slane %v3308_v10, 4  ;;  %3674 = vpush %v3286_v56 }
 0x4c8   :  { %3676 = vpush %v3300_v54 }
 0x4c9   :  { %v3310_v27 = vadd.f32 %v3309_v55, %v3308_v10 }
 0x4cb   :  { %v3311_v8 = vrot.slane %v3310_v27, 2 }
 0x4cd   :  { %v3312_v52 = vadd.f32 %v3311_v8, %v3310_v27 }
 0x4cf   :  { %v3313_v22 = vrot.slane %v3312_v52, 1 }
 0x4d1   :  { %v3314_v40 = vadd.f32 %v3313_v22, %v3312_v52 }
 0x4d3   :  { %3678 = vpush %v3314_v40 }
 0x4f8   :  { %s3675_s1 = spop %3674 }
 0x4f9   :  { %s3677_s11 = spop %3676  ;;  %v3317_v35 = vstv %s3675_s1 }
 0x4fa   :  { %v3320_v17 = vstv %s3677_s11  ;;  %v3318_v30 = vsel %vm3316_vm9, %v3317_v35, 0.0 }
 0x4fb   :  { %v3321_v24 = vsel %vm3319_vm10, %v3320_v17, 0.0 }
 0x4fc   :  { %v3322_v36 = vadd.f32 %v3321_v24, %v3318_v30 }
 0x504   :  { %s3679_s12 = spop %3678 }
 0x505   :  { %v3324_v19 = vstv %s3679_s12 }
 0x506   :  { %v3325_v46 = vsel %vm3323_vm11, %v3324_v19, 0.0 }
 0x507   :  { %v3326_v2 = vadd.f32 %v3325_v46, %v3322_v36 }
 0x509   :  { %3327 = vst [vmem:[#allocation8] sm:$0x1] %v3326_v2 }
 0x50a   :  { %3803 = shalt.err (!%p3800_p5)
}
 0x50b   :  { %3337 = dma.vmem_to_hbm [thread:$0]  %s3335_s14, 16, %s4470_s7, [#allocation4]  }
 0x50c   :  { %3816 = dma.done.wait [#allocation4], 16  }
 0x50d   :  { %3817 = vsyncadd [#allocation4], 4294967280 }
 0x50e   :  { %3341 = vsyncpa [#allocation3], 1 }
 0x50f   :  { %3342 = vsyncpa [#allocation6], 1 }
 0x510   :  { %3343 = vsyncpa [#allocation4], 1 }

</bundles_post_ra>
